<compile_context>
chip_gen: v7x
topology: tpu7x:2x2x1
jax: 0.10.0
libtpu: 0.0.40
codegen_flags: <defaults>
</compile_context>

<pallas_src>
import functools

import jax
import jax.numpy as jnp
from jax.experimental import pallas as pl
from jax.experimental.pallas import tpu as pltpu


def _tree_sum(terms):
    """Pairwise (tree) sum -> several independent add chains for VALU ILP."""
    terms = list(terms)
    while len(terms) > 1:
        nxt = [terms[i] + terms[i + 1] for i in range(0, len(terms) - 1, 2)]
        if len(terms) % 2:
            nxt.append(terms[-1])
        terms = nxt
    return terms[0]


def _spatial_attention_kernel(x_ref, rc_ref, w_ref, o_ref, *, C, H, W, K):
    """x_ref: (Bt, C, H*W) VMEM; rc_ref: (2, H*W) int32 row/col indices;
    w_ref: (2*K*K,) f32 SMEM conv taps; o_ref: (Bt, 1, H*W)."""
    P = K // 2
    HW = H * W
    Bt = x_ref.shape[0]

    xb = x_ref[...]                                            # (Bt, C, HW)
    # Channel-wise mean / max (PyTorch dim=1): f32-accumulated sum, max in the
    # input dtype -> no full f32 copy of the block is kept live.
    avg = jnp.sum(xb, axis=1, dtype=jnp.float32) * jnp.float32(1.0 / C)
    mx = jnp.max(xb, axis=1).astype(jnp.float32)               # (Bt, HW)

    # Precomputed (in the wrapper) row / col index of every flattened spatial
    # position; used only to mask the zero "same" padding at image borders.
    row = rc_ref[0:1, :]                                       # (1, HW) int32
    col = rc_ref[1:2, :]                                       # (1, HW) int32

    def conv_channel(feat, w_base):
        # Hoisted row shifts: K XLU rolls (+ row border masks) per channel.
        rows = []
        for di in range(-P, P + 1):
            if di == 0:
                rows.append(feat)
            else:
                shifted = pltpu.roll(feat, shift=(-di * W) % HW, axis=1)
                valid = (row >= -di) if di < 0 else (row < H - di)
                rows.append(jnp.where(valid, shifted, 0.0))
        # Per column offset: an independent K-tap weighted sum over the row
        # shifts (tree-summed), then a single lane roll + column border mask.
        col_terms = []
        for dj in range(-P, P + 1):
            taps = [rows[ki] * w_ref[w_base + ki * K + (dj + P)]
                    for ki in range(K)]
            inner = _tree_sum(taps)
            if dj != 0:
                inner = pltpu.roll(inner, shift=(-dj) % HW, axis=1)
                valid = (col >= -dj) if dj < 0 else (col < W - dj)
                inner = jnp.where(valid, inner, 0.0)
            col_terms.append(inner)
        return _tree_sum(col_terms)

    logits = conv_channel(avg, 0) + conv_channel(mx, K * K)    # (Bt, HW)
    sig = jax.nn.sigmoid(logits).astype(o_ref.dtype)

    if Bt == 1:
        o_ref[...] = sig.reshape(1, 1, HW)
    else:
        # Static per-image stores avoid relayouting the sublane-packed value.
        for b in range(Bt):
            o_ref[b, :, :] = sig[b:b + 1, :]


def _pick_block_b(B, C, HW, itemsize):
    """Batch-block size: large enough to amortise the ~600-cycle grid-step
    overhead, small enough that the double-buffered input block stays inside
    the default scoped-VMEM budget on every generation (v7x: 32 of 64 MiB),
    and >= 2 balanced grid steps when possible for v7x's two TensorCores."""
    budget_bytes = 6 * 1024 * 1024                 # per single input buffer
    per_image = max(1, C * HW * itemsize)
    bb = max(1, min(B, budget_bytes // per_image))
    if B >= 2:
        bb = min(bb, (B + 1) // 2)
    while B % bb:                                  # evenly divide B
        bb -= 1
    return bb


def spatial_attention(x, weight, kernel_size=7, block_b=None):
    """x: (B, C, H, W); weight: (1, 2, K, K) PyTorch Conv2d weight (bias=False)."""
    B, C, H, W = x.shape
    K = kernel_size
    HW = H * W

    x_flat = x.reshape(B, C, HW)                    # lane-dense minor dim
    w_flat = weight.reshape(-1).astype(jnp.float32)  # (2*K*K,) scalar taps

    # Row / col index of each flattened spatial position (computed once here,
    # outside the kernel, so the kernel needs no vector integer div/mod).
    sp = jnp.arange(HW, dtype=jnp.int32)
    rc = jnp.stack([sp // W, sp % W]).astype(jnp.int32)   # (2, HW)

    if block_b is None:
        block_b = _pick_block_b(B, C, HW, x.dtype.itemsize)

    kernel = functools.partial(_spatial_attention_kernel, C=C, H=H, W=W, K=K)

    out = pl.pallas_call(
        kernel,
        out_shape=jax.ShapeDtypeStruct((B, 1, HW), x.dtype),
        grid_spec=pltpu.PrefetchScalarGridSpec(
            num_scalar_prefetch=0,
            grid=(B // block_b,),
            in_specs=[
                pl.BlockSpec((block_b, C, HW), lambda b: (b, 0, 0)),
                pl.BlockSpec((2, HW), lambda b: (0, 0)),
                pl.BlockSpec(memory_space=pltpu.MemorySpace.SMEM),
            ],
            out_specs=pl.BlockSpec((block_b, 1, HW), lambda b: (b, 0, 0)),
        ),
        compiler_params=pltpu.CompilerParams(
            dimension_semantics=("parallel",),
            vmem_limit_bytes=32 * 1024 * 1024,
        ),
    )(x_flat, rc, w_flat)

    return out.reshape(B, 1, H, W)


def _reference(x, weight, kernel_size=7):
    # Pure-JAX reference matching the PyTorch forward.
    avg = jnp.mean(x, axis=1, keepdims=True)
    mx = jnp.max(x, axis=1, keepdims=True)
    feat = jnp.concatenate([avg, mx], axis=1)       # (B, 2, H, W)
    p = kernel_size // 2
    y = jax.lax.conv_general_dilated(
        feat, weight,
        window_strides=(1, 1),
        padding=[(p, p), (p, p)],
        dimension_numbers=("NCHW", "OIHW", "NCHW"),
    )
    return jax.nn.sigmoid(y)


if __name__ == "__main__":
    B, C, H, W = 2, 4, 16, 16
    K = 7

    key = jax.random.PRNGKey(0)
    kx, kw = jax.random.split(key)

    x = jax.random.normal(kx, (B, C, H, W), dtype=jnp.float32)

    # Deterministic conv weight init (kaiming-uniform-like bound, bias=False).
    fan_in = 2 * K * K
    bound = 1.0 / jnp.sqrt(jnp.float32(fan_in))
    weight = jax.random.uniform(
        kw, (1, 2, K, K), minval=-bound, maxval=bound, dtype=jnp.float32
    )

    out = spatial_attention(x, weight, kernel_size=K)
    out = jax.block_until_ready(out)

    ref = _reference(x, weight, kernel_size=K)
    assert out.shape == (B, 1, H, W)
    assert jnp.allclose(out, ref, atol=1e-5, rtol=1e-5)

    print("KERNEL_OK")
</pallas_src>

<mosaic_0001>
module attributes {stable_mosaic.version = 11 : i64} {
  func.func @_spatial_attention_kernel(%arg0: i32, %arg1: memref<1x4x256xf32, #tpu.memory_space<vmem>>, %arg2: memref<2x256xi32, #tpu.memory_space<vmem>>, %arg3: memref<98xf32, #tpu.memory_space<smem>>, %arg4: memref<1x1x256xf32, #tpu.memory_space<vmem>>) attributes {dimension_semantics = [#tpu.dimension_semantics<parallel>], iteration_bounds = array<i64: 2>, scalar_prefetch = 0 : i64, scratch_operands = 0 : i64, tpu.core_type = #tpu.core_type<tc>, window_params = [{transform_indices = @transform_0, window_bounds = array<i64: 1, 4, 256>}, {pipeline_mode = #tpu.pipeline_mode<synchronous>, transform_indices = @transform_1, window_bounds = array<i64: 2, 256>}, {transform_indices = @transform_2, window_bounds = array<i64: 98>}, {transform_indices = @transform_3, window_bounds = array<i64: 1, 1, 256>}]} {
    %c0 = arith.constant 0 : index
    %c0_0 = arith.constant 0 : index
    %c0_1 = arith.constant 0 : index
    %0 = vector.load %arg1[%c0, %c0_0, %c0_1] : memref<1x4x256xf32, #tpu.memory_space<vmem>>, vector<1x4x256xf32>
    %cst = arith.constant dense<0.000000e+00> : vector<1x256xf32>
    %1 = vector.multi_reduction <add>, %0, %cst [1] : vector<1x4x256xf32> to vector<1x256xf32>
    %cst_2 = arith.constant 2.500000e-01 : f32
    %2 = vector.broadcast %cst_2 : f32 to vector<1x256xf32>
    %3 = arith.mulf %1, %2 : vector<1x256xf32>
    %cst_3 = arith.constant dense<0xFF800000> : vector<1x256xf32>
    %4 = vector.multi_reduction <maximumf>, %0, %cst_3 [1] : vector<1x4x256xf32> to vector<1x256xf32>
    %c0_4 = arith.constant 0 : index
    %c0_5 = arith.constant 0 : index
    %5 = vector.load %arg2[%c0_4, %c0_5] : memref<2x256xi32, #tpu.memory_space<vmem>>, vector<1x256xi32>
    %c1 = arith.constant 1 : index
    %c0_6 = arith.constant 0 : index
    %6 = vector.load %arg2[%c1, %c0_6] : memref<2x256xi32, #tpu.memory_space<vmem>>, vector<1x256xi32>
    %c48_i32 = arith.constant 48 : i32
    %7 = tpu.dynamic_rotate %3 by %c48_i32 dim 1 : vector<1x256xf32>, i32 -> vector<1x256xf32>
    %c3_i32 = arith.constant 3 : i32
    %8 = vector.broadcast %c3_i32 : i32 to vector<1x256xi32>
    %9 = arith.cmpi sge, %5, %8 : vector<1x256xi32>
    %cst_7 = arith.constant 0.000000e+00 : f32
    %10 = vector.broadcast %cst_7 : f32 to vector<1x256xf32>
    %11 = arith.select %9, %7, %10 : vector<1x256xi1>, vector<1x256xf32>
    %c32_i32 = arith.constant 32 : i32
    %12 = tpu.dynamic_rotate %3 by %c32_i32 dim 1 : vector<1x256xf32>, i32 -> vector<1x256xf32>
    %c2_i32 = arith.constant 2 : i32
    %13 = vector.broadcast %c2_i32 : i32 to vector<1x256xi32>
    %14 = arith.cmpi sge, %5, %13 : vector<1x256xi32>
    %cst_8 = arith.constant 0.000000e+00 : f32
    %15 = vector.broadcast %cst_8 : f32 to vector<1x256xf32>
    %16 = arith.select %14, %12, %15 : vector<1x256xi1>, vector<1x256xf32>
    %c16_i32 = arith.constant 16 : i32
    %17 = tpu.dynamic_rotate %3 by %c16_i32 dim 1 : vector<1x256xf32>, i32 -> vector<1x256xf32>
    %c1_i32 = arith.constant 1 : i32
    %18 = vector.broadcast %c1_i32 : i32 to vector<1x256xi32>
    %19 = arith.cmpi sge, %5, %18 : vector<1x256xi32>
    %cst_9 = arith.constant 0.000000e+00 : f32
    %20 = vector.broadcast %cst_9 : f32 to vector<1x256xf32>
    %21 = arith.select %19, %17, %20 : vector<1x256xi1>, vector<1x256xf32>
    %c240_i32 = arith.constant 240 : i32
    %22 = tpu.dynamic_rotate %3 by %c240_i32 dim 1 : vector<1x256xf32>, i32 -> vector<1x256xf32>
    %c15_i32 = arith.constant 15 : i32
    %23 = vector.broadcast %c15_i32 : i32 to vector<1x256xi32>
    %24 = arith.cmpi slt, %5, %23 : vector<1x256xi32>
    %cst_10 = arith.constant 0.000000e+00 : f32
    %25 = vector.broadcast %cst_10 : f32 to vector<1x256xf32>
    %26 = arith.select %24, %22, %25 : vector<1x256xi1>, vector<1x256xf32>
    %c224_i32 = arith.constant 224 : i32
    %27 = tpu.dynamic_rotate %3 by %c224_i32 dim 1 : vector<1x256xf32>, i32 -> vector<1x256xf32>
    %c14_i32 = arith.constant 14 : i32
    %28 = vector.broadcast %c14_i32 : i32 to vector<1x256xi32>
    %29 = arith.cmpi slt, %5, %28 : vector<1x256xi32>
    %cst_11 = arith.constant 0.000000e+00 : f32
    %30 = vector.broadcast %cst_11 : f32 to vector<1x256xf32>
    %31 = arith.select %29, %27, %30 : vector<1x256xi1>, vector<1x256xf32>
    %c208_i32 = arith.constant 208 : i32
    %32 = tpu.dynamic_rotate %3 by %c208_i32 dim 1 : vector<1x256xf32>, i32 -> vector<1x256xf32>
    %c13_i32 = arith.constant 13 : i32
    %33 = vector.broadcast %c13_i32 : i32 to vector<1x256xi32>
    %34 = arith.cmpi slt, %5, %33 : vector<1x256xi32>
    %cst_12 = arith.constant 0.000000e+00 : f32
    %35 = vector.broadcast %cst_12 : f32 to vector<1x256xf32>
    %36 = arith.select %34, %32, %35 : vector<1x256xi1>, vector<1x256xf32>
    %c0_13 = arith.constant 0 : index
    %37 = memref.load %arg3[%c0_13] : memref<98xf32, #tpu.memory_space<smem>>
    %38 = vector.broadcast %37 : f32 to vector<1x256xf32>
    %39 = arith.mulf %11, %38 : vector<1x256xf32>
    %c7 = arith.constant 7 : index
    %40 = memref.load %arg3[%c7] : memref<98xf32, #tpu.memory_space<smem>>
    %41 = vector.broadcast %40 : f32 to vector<1x256xf32>
    %42 = arith.mulf %16, %41 : vector<1x256xf32>
    %c14 = arith.constant 14 : index
    %43 = memref.load %arg3[%c14] : memref<98xf32, #tpu.memory_space<smem>>
    %44 = vector.broadcast %43 : f32 to vector<1x256xf32>
    %45 = arith.mulf %21, %44 : vector<1x256xf32>
    %c21 = arith.constant 21 : index
    %46 = memref.load %arg3[%c21] : memref<98xf32, #tpu.memory_space<smem>>
    %47 = vector.broadcast %46 : f32 to vector<1x256xf32>
    %48 = arith.mulf %3, %47 : vector<1x256xf32>
    %c28 = arith.constant 28 : index
    %49 = memref.load %arg3[%c28] : memref<98xf32, #tpu.memory_space<smem>>
    %50 = vector.broadcast %49 : f32 to vector<1x256xf32>
    %51 = arith.mulf %26, %50 : vector<1x256xf32>
    %c35 = arith.constant 35 : index
    %52 = memref.load %arg3[%c35] : memref<98xf32, #tpu.memory_space<smem>>
    %53 = vector.broadcast %52 : f32 to vector<1x256xf32>
    %54 = arith.mulf %31, %53 : vector<1x256xf32>
    %c42 = arith.constant 42 : index
    %55 = memref.load %arg3[%c42] : memref<98xf32, #tpu.memory_space<smem>>
    %56 = vector.broadcast %55 : f32 to vector<1x256xf32>
    %57 = arith.mulf %36, %56 : vector<1x256xf32>
    %58 = arith.addf %39, %42 : vector<1x256xf32>
    %59 = arith.addf %45, %48 : vector<1x256xf32>
    %60 = arith.addf %51, %54 : vector<1x256xf32>
    %61 = arith.addf %58, %59 : vector<1x256xf32>
    %62 = arith.addf %60, %57 : vector<1x256xf32>
    %63 = arith.addf %61, %62 : vector<1x256xf32>
    %c3_i32_14 = arith.constant 3 : i32
    %64 = tpu.dynamic_rotate %63 by %c3_i32_14 dim 1 : vector<1x256xf32>, i32 -> vector<1x256xf32>
    %c3_i32_15 = arith.constant 3 : i32
    %65 = vector.broadcast %c3_i32_15 : i32 to vector<1x256xi32>
    %66 = arith.cmpi sge, %6, %65 : vector<1x256xi32>
    %cst_16 = arith.constant 0.000000e+00 : f32
    %67 = vector.broadcast %cst_16 : f32 to vector<1x256xf32>
    %68 = arith.select %66, %64, %67 : vector<1x256xi1>, vector<1x256xf32>
    %c1_17 = arith.constant 1 : index
    %69 = memref.load %arg3[%c1_17] : memref<98xf32, #tpu.memory_space<smem>>
    %70 = vector.broadcast %69 : f32 to vector<1x256xf32>
    %71 = arith.mulf %11, %70 : vector<1x256xf32>
    %c8 = arith.constant 8 : index
    %72 = memref.load %arg3[%c8] : memref<98xf32, #tpu.memory_space<smem>>
    %73 = vector.broadcast %72 : f32 to vector<1x256xf32>
    %74 = arith.mulf %16, %73 : vector<1x256xf32>
    %c15 = arith.constant 15 : index
    %75 = memref.load %arg3[%c15] : memref<98xf32, #tpu.memory_space<smem>>
    %76 = vector.broadcast %75 : f32 to vector<1x256xf32>
    %77 = arith.mulf %21, %76 : vector<1x256xf32>
    %c22 = arith.constant 22 : index
    %78 = memref.load %arg3[%c22] : memref<98xf32, #tpu.memory_space<smem>>
    %79 = vector.broadcast %78 : f32 to vector<1x256xf32>
    %80 = arith.mulf %3, %79 : vector<1x256xf32>
    %c29 = arith.constant 29 : index
    %81 = memref.load %arg3[%c29] : memref<98xf32, #tpu.memory_space<smem>>
    %82 = vector.broadcast %81 : f32 to vector<1x256xf32>
    %83 = arith.mulf %26, %82 : vector<1x256xf32>
    %c36 = arith.constant 36 : index
    %84 = memref.load %arg3[%c36] : memref<98xf32, #tpu.memory_space<smem>>
    %85 = vector.broadcast %84 : f32 to vector<1x256xf32>
    %86 = arith.mulf %31, %85 : vector<1x256xf32>
    %c43 = arith.constant 43 : index
    %87 = memref.load %arg3[%c43] : memref<98xf32, #tpu.memory_space<smem>>
    %88 = vector.broadcast %87 : f32 to vector<1x256xf32>
    %89 = arith.mulf %36, %88 : vector<1x256xf32>
    %90 = arith.addf %71, %74 : vector<1x256xf32>
    %91 = arith.addf %77, %80 : vector<1x256xf32>
    %92 = arith.addf %83, %86 : vector<1x256xf32>
    %93 = arith.addf %90, %91 : vector<1x256xf32>
    %94 = arith.addf %92, %89 : vector<1x256xf32>
    %95 = arith.addf %93, %94 : vector<1x256xf32>
    %c2_i32_18 = arith.constant 2 : i32
    %96 = tpu.dynamic_rotate %95 by %c2_i32_18 dim 1 : vector<1x256xf32>, i32 -> vector<1x256xf32>
    %c2_i32_19 = arith.constant 2 : i32
    %97 = vector.broadcast %c2_i32_19 : i32 to vector<1x256xi32>
    %98 = arith.cmpi sge, %6, %97 : vector<1x256xi32>
    %cst_20 = arith.constant 0.000000e+00 : f32
    %99 = vector.broadcast %cst_20 : f32 to vector<1x256xf32>
    %100 = arith.select %98, %96, %99 : vector<1x256xi1>, vector<1x256xf32>
    %c2 = arith.constant 2 : index
    %101 = memref.load %arg3[%c2] : memref<98xf32, #tpu.memory_space<smem>>
    %102 = vector.broadcast %101 : f32 to vector<1x256xf32>
    %103 = arith.mulf %11, %102 : vector<1x256xf32>
    %c9 = arith.constant 9 : index
    %104 = memref.load %arg3[%c9] : memref<98xf32, #tpu.memory_space<smem>>
    %105 = vector.broadcast %104 : f32 to vector<1x256xf32>
    %106 = arith.mulf %16, %105 : vector<1x256xf32>
    %c16 = arith.constant 16 : index
    %107 = memref.load %arg3[%c16] : memref<98xf32, #tpu.memory_space<smem>>
    %108 = vector.broadcast %107 : f32 to vector<1x256xf32>
    %109 = arith.mulf %21, %108 : vector<1x256xf32>
    %c23 = arith.constant 23 : index
    %110 = memref.load %arg3[%c23] : memref<98xf32, #tpu.memory_space<smem>>
    %111 = vector.broadcast %110 : f32 to vector<1x256xf32>
    %112 = arith.mulf %3, %111 : vector<1x256xf32>
    %c30 = arith.constant 30 : index
    %113 = memref.load %arg3[%c30] : memref<98xf32, #tpu.memory_space<smem>>
    %114 = vector.broadcast %113 : f32 to vector<1x256xf32>
    %115 = arith.mulf %26, %114 : vector<1x256xf32>
    %c37 = arith.constant 37 : index
    %116 = memref.load %arg3[%c37] : memref<98xf32, #tpu.memory_space<smem>>
    %117 = vector.broadcast %116 : f32 to vector<1x256xf32>
    %118 = arith.mulf %31, %117 : vector<1x256xf32>
    %c44 = arith.constant 44 : index
    %119 = memref.load %arg3[%c44] : memref<98xf32, #tpu.memory_space<smem>>
    %120 = vector.broadcast %119 : f32 to vector<1x256xf32>
    %121 = arith.mulf %36, %120 : vector<1x256xf32>
    %122 = arith.addf %103, %106 : vector<1x256xf32>
    %123 = arith.addf %109, %112 : vector<1x256xf32>
    %124 = arith.addf %115, %118 : vector<1x256xf32>
    %125 = arith.addf %122, %123 : vector<1x256xf32>
    %126 = arith.addf %124, %121 : vector<1x256xf32>
    %127 = arith.addf %125, %126 : vector<1x256xf32>
    %c1_i32_21 = arith.constant 1 : i32
    %128 = tpu.dynamic_rotate %127 by %c1_i32_21 dim 1 : vector<1x256xf32>, i32 -> vector<1x256xf32>
    %c1_i32_22 = arith.constant 1 : i32
    %129 = vector.broadcast %c1_i32_22 : i32 to vector<1x256xi32>
    %130 = arith.cmpi sge, %6, %129 : vector<1x256xi32>
    %cst_23 = arith.constant 0.000000e+00 : f32
    %131 = vector.broadcast %cst_23 : f32 to vector<1x256xf32>
    %132 = arith.select %130, %128, %131 : vector<1x256xi1>, vector<1x256xf32>
    %c3 = arith.constant 3 : index
    %133 = memref.load %arg3[%c3] : memref<98xf32, #tpu.memory_space<smem>>
    %134 = vector.broadcast %133 : f32 to vector<1x256xf32>
    %135 = arith.mulf %11, %134 : vector<1x256xf32>
    %c10 = arith.constant 10 : index
    %136 = memref.load %arg3[%c10] : memref<98xf32, #tpu.memory_space<smem>>
    %137 = vector.broadcast %136 : f32 to vector<1x256xf32>
    %138 = arith.mulf %16, %137 : vector<1x256xf32>
    %c17 = arith.constant 17 : index
    %139 = memref.load %arg3[%c17] : memref<98xf32, #tpu.memory_space<smem>>
    %140 = vector.broadcast %139 : f32 to vector<1x256xf32>
    %141 = arith.mulf %21, %140 : vector<1x256xf32>
    %c24 = arith.constant 24 : index
    %142 = memref.load %arg3[%c24] : memref<98xf32, #tpu.memory_space<smem>>
    %143 = vector.broadcast %142 : f32 to vector<1x256xf32>
    %144 = arith.mulf %3, %143 : vector<1x256xf32>
    %c31 = arith.constant 31 : index
    %145 = memref.load %arg3[%c31] : memref<98xf32, #tpu.memory_space<smem>>
    %146 = vector.broadcast %145 : f32 to vector<1x256xf32>
    %147 = arith.mulf %26, %146 : vector<1x256xf32>
    %c38 = arith.constant 38 : index
    %148 = memref.load %arg3[%c38] : memref<98xf32, #tpu.memory_space<smem>>
    %149 = vector.broadcast %148 : f32 to vector<1x256xf32>
    %150 = arith.mulf %31, %149 : vector<1x256xf32>
    %c45 = arith.constant 45 : index
    %151 = memref.load %arg3[%c45] : memref<98xf32, #tpu.memory_space<smem>>
    %152 = vector.broadcast %151 : f32 to vector<1x256xf32>
    %153 = arith.mulf %36, %152 : vector<1x256xf32>
    %154 = arith.addf %135, %138 : vector<1x256xf32>
    %155 = arith.addf %141, %144 : vector<1x256xf32>
    %156 = arith.addf %147, %150 : vector<1x256xf32>
    %157 = arith.addf %154, %155 : vector<1x256xf32>
    %158 = arith.addf %156, %153 : vector<1x256xf32>
    %159 = arith.addf %157, %158 : vector<1x256xf32>
    %c4 = arith.constant 4 : index
    %160 = memref.load %arg3[%c4] : memref<98xf32, #tpu.memory_space<smem>>
    %161 = vector.broadcast %160 : f32 to vector<1x256xf32>
    %162 = arith.mulf %11, %161 : vector<1x256xf32>
    %c11 = arith.constant 11 : index
    %163 = memref.load %arg3[%c11] : memref<98xf32, #tpu.memory_space<smem>>
    %164 = vector.broadcast %163 : f32 to vector<1x256xf32>
    %165 = arith.mulf %16, %164 : vector<1x256xf32>
    %c18 = arith.constant 18 : index
    %166 = memref.load %arg3[%c18] : memref<98xf32, #tpu.memory_space<smem>>
    %167 = vector.broadcast %166 : f32 to vector<1x256xf32>
    %168 = arith.mulf %21, %167 : vector<1x256xf32>
    %c25 = arith.constant 25 : index
    %169 = memref.load %arg3[%c25] : memref<98xf32, #tpu.memory_space<smem>>
    %170 = vector.broadcast %169 : f32 to vector<1x256xf32>
    %171 = arith.mulf %3, %170 : vector<1x256xf32>
    %c32 = arith.constant 32 : index
    %172 = memref.load %arg3[%c32] : memref<98xf32, #tpu.memory_space<smem>>
    %173 = vector.broadcast %172 : f32 to vector<1x256xf32>
    %174 = arith.mulf %26, %173 : vector<1x256xf32>
    %c39 = arith.constant 39 : index
    %175 = memref.load %arg3[%c39] : memref<98xf32, #tpu.memory_space<smem>>
    %176 = vector.broadcast %175 : f32 to vector<1x256xf32>
    %177 = arith.mulf %31, %176 : vector<1x256xf32>
    %c46 = arith.constant 46 : index
    %178 = memref.load %arg3[%c46] : memref<98xf32, #tpu.memory_space<smem>>
    %179 = vector.broadcast %178 : f32 to vector<1x256xf32>
    %180 = arith.mulf %36, %179 : vector<1x256xf32>
    %181 = arith.addf %162, %165 : vector<1x256xf32>
    %182 = arith.addf %168, %171 : vector<1x256xf32>
    %183 = arith.addf %174, %177 : vector<1x256xf32>
    %184 = arith.addf %181, %182 : vector<1x256xf32>
    %185 = arith.addf %183, %180 : vector<1x256xf32>
    %186 = arith.addf %184, %185 : vector<1x256xf32>
    %c255_i32 = arith.constant 255 : i32
    %187 = tpu.dynamic_rotate %186 by %c255_i32 dim 1 : vector<1x256xf32>, i32 -> vector<1x256xf32>
    %c15_i32_24 = arith.constant 15 : i32
    %188 = vector.broadcast %c15_i32_24 : i32 to vector<1x256xi32>
    %189 = arith.cmpi slt, %6, %188 : vector<1x256xi32>
    %cst_25 = arith.constant 0.000000e+00 : f32
    %190 = vector.broadcast %cst_25 : f32 to vector<1x256xf32>
    %191 = arith.select %189, %187, %190 : vector<1x256xi1>, vector<1x256xf32>
    %c5 = arith.constant 5 : index
    %192 = memref.load %arg3[%c5] : memref<98xf32, #tpu.memory_space<smem>>
    %193 = vector.broadcast %192 : f32 to vector<1x256xf32>
    %194 = arith.mulf %11, %193 : vector<1x256xf32>
    %c12 = arith.constant 12 : index
    %195 = memref.load %arg3[%c12] : memref<98xf32, #tpu.memory_space<smem>>
    %196 = vector.broadcast %195 : f32 to vector<1x256xf32>
    %197 = arith.mulf %16, %196 : vector<1x256xf32>
    %c19 = arith.constant 19 : index
    %198 = memref.load %arg3[%c19] : memref<98xf32, #tpu.memory_space<smem>>
    %199 = vector.broadcast %198 : f32 to vector<1x256xf32>
    %200 = arith.mulf %21, %199 : vector<1x256xf32>
    %c26 = arith.constant 26 : index
    %201 = memref.load %arg3[%c26] : memref<98xf32, #tpu.memory_space<smem>>
    %202 = vector.broadcast %201 : f32 to vector<1x256xf32>
    %203 = arith.mulf %3, %202 : vector<1x256xf32>
    %c33 = arith.constant 33 : index
    %204 = memref.load %arg3[%c33] : memref<98xf32, #tpu.memory_space<smem>>
    %205 = vector.broadcast %204 : f32 to vector<1x256xf32>
    %206 = arith.mulf %26, %205 : vector<1x256xf32>
    %c40 = arith.constant 40 : index
    %207 = memref.load %arg3[%c40] : memref<98xf32, #tpu.memory_space<smem>>
    %208 = vector.broadcast %207 : f32 to vector<1x256xf32>
    %209 = arith.mulf %31, %208 : vector<1x256xf32>
    %c47 = arith.constant 47 : index
    %210 = memref.load %arg3[%c47] : memref<98xf32, #tpu.memory_space<smem>>
    %211 = vector.broadcast %210 : f32 to vector<1x256xf32>
    %212 = arith.mulf %36, %211 : vector<1x256xf32>
    %213 = arith.addf %194, %197 : vector<1x256xf32>
    %214 = arith.addf %200, %203 : vector<1x256xf32>
    %215 = arith.addf %206, %209 : vector<1x256xf32>
    %216 = arith.addf %213, %214 : vector<1x256xf32>
    %217 = arith.addf %215, %212 : vector<1x256xf32>
    %218 = arith.addf %216, %217 : vector<1x256xf32>
    %c254_i32 = arith.constant 254 : i32
    %219 = tpu.dynamic_rotate %218 by %c254_i32 dim 1 : vector<1x256xf32>, i32 -> vector<1x256xf32>
    %c14_i32_26 = arith.constant 14 : i32
    %220 = vector.broadcast %c14_i32_26 : i32 to vector<1x256xi32>
    %221 = arith.cmpi slt, %6, %220 : vector<1x256xi32>
    %cst_27 = arith.constant 0.000000e+00 : f32
    %222 = vector.broadcast %cst_27 : f32 to vector<1x256xf32>
    %223 = arith.select %221, %219, %222 : vector<1x256xi1>, vector<1x256xf32>
    %c6 = arith.constant 6 : index
    %224 = memref.load %arg3[%c6] : memref<98xf32, #tpu.memory_space<smem>>
    %225 = vector.broadcast %224 : f32 to vector<1x256xf32>
    %226 = arith.mulf %11, %225 : vector<1x256xf32>
    %c13 = arith.constant 13 : index
    %227 = memref.load %arg3[%c13] : memref<98xf32, #tpu.memory_space<smem>>
    %228 = vector.broadcast %227 : f32 to vector<1x256xf32>
    %229 = arith.mulf %16, %228 : vector<1x256xf32>
    %c20 = arith.constant 20 : index
    %230 = memref.load %arg3[%c20] : memref<98xf32, #tpu.memory_space<smem>>
    %231 = vector.broadcast %230 : f32 to vector<1x256xf32>
    %232 = arith.mulf %21, %231 : vector<1x256xf32>
    %c27 = arith.constant 27 : index
    %233 = memref.load %arg3[%c27] : memref<98xf32, #tpu.memory_space<smem>>
    %234 = vector.broadcast %233 : f32 to vector<1x256xf32>
    %235 = arith.mulf %3, %234 : vector<1x256xf32>
    %c34 = arith.constant 34 : index
    %236 = memref.load %arg3[%c34] : memref<98xf32, #tpu.memory_space<smem>>
    %237 = vector.broadcast %236 : f32 to vector<1x256xf32>
    %238 = arith.mulf %26, %237 : vector<1x256xf32>
    %c41 = arith.constant 41 : index
    %239 = memref.load %arg3[%c41] : memref<98xf32, #tpu.memory_space<smem>>
    %240 = vector.broadcast %239 : f32 to vector<1x256xf32>
    %241 = arith.mulf %31, %240 : vector<1x256xf32>
    %c48 = arith.constant 48 : index
    %242 = memref.load %arg3[%c48] : memref<98xf32, #tpu.memory_space<smem>>
    %243 = vector.broadcast %242 : f32 to vector<1x256xf32>
    %244 = arith.mulf %36, %243 : vector<1x256xf32>
    %245 = arith.addf %226, %229 : vector<1x256xf32>
    %246 = arith.addf %232, %235 : vector<1x256xf32>
    %247 = arith.addf %238, %241 : vector<1x256xf32>
    %248 = arith.addf %245, %246 : vector<1x256xf32>
    %249 = arith.addf %247, %244 : vector<1x256xf32>
    %250 = arith.addf %248, %249 : vector<1x256xf32>
    %c253_i32 = arith.constant 253 : i32
    %251 = tpu.dynamic_rotate %250 by %c253_i32 dim 1 : vector<1x256xf32>, i32 -> vector<1x256xf32>
    %c13_i32_28 = arith.constant 13 : i32
    %252 = vector.broadcast %c13_i32_28 : i32 to vector<1x256xi32>
    %253 = arith.cmpi slt, %6, %252 : vector<1x256xi32>
    %cst_29 = arith.constant 0.000000e+00 : f32
    %254 = vector.broadcast %cst_29 : f32 to vector<1x256xf32>
    %255 = arith.select %253, %251, %254 : vector<1x256xi1>, vector<1x256xf32>
    %256 = arith.addf %68, %100 : vector<1x256xf32>
    %257 = arith.addf %132, %159 : vector<1x256xf32>
    %258 = arith.addf %191, %223 : vector<1x256xf32>
    %259 = arith.addf %256, %257 : vector<1x256xf32>
    %260 = arith.addf %258, %255 : vector<1x256xf32>
    %261 = arith.addf %259, %260 : vector<1x256xf32>
    %c48_i32_30 = arith.constant 48 : i32
    %262 = tpu.dynamic_rotate %4 by %c48_i32_30 dim 1 : vector<1x256xf32>, i32 -> vector<1x256xf32>
    %c3_i32_31 = arith.constant 3 : i32
    %263 = vector.broadcast %c3_i32_31 : i32 to vector<1x256xi32>
    %264 = arith.cmpi sge, %5, %263 : vector<1x256xi32>
    %cst_32 = arith.constant 0.000000e+00 : f32
    %265 = vector.broadcast %cst_32 : f32 to vector<1x256xf32>
    %266 = arith.select %264, %262, %265 : vector<1x256xi1>, vector<1x256xf32>
    %c32_i32_33 = arith.constant 32 : i32
    %267 = tpu.dynamic_rotate %4 by %c32_i32_33 dim 1 : vector<1x256xf32>, i32 -> vector<1x256xf32>
    %c2_i32_34 = arith.constant 2 : i32
    %268 = vector.broadcast %c2_i32_34 : i32 to vector<1x256xi32>
    %269 = arith.cmpi sge, %5, %268 : vector<1x256xi32>
    %cst_35 = arith.constant 0.000000e+00 : f32
    %270 = vector.broadcast %cst_35 : f32 to vector<1x256xf32>
    %271 = arith.select %269, %267, %270 : vector<1x256xi1>, vector<1x256xf32>
    %c16_i32_36 = arith.constant 16 : i32
    %272 = tpu.dynamic_rotate %4 by %c16_i32_36 dim 1 : vector<1x256xf32>, i32 -> vector<1x256xf32>
    %c1_i32_37 = arith.constant 1 : i32
    %273 = vector.broadcast %c1_i32_37 : i32 to vector<1x256xi32>
    %274 = arith.cmpi sge, %5, %273 : vector<1x256xi32>
    %cst_38 = arith.constant 0.000000e+00 : f32
    %275 = vector.broadcast %cst_38 : f32 to vector<1x256xf32>
    %276 = arith.select %274, %272, %275 : vector<1x256xi1>, vector<1x256xf32>
    %c240_i32_39 = arith.constant 240 : i32
    %277 = tpu.dynamic_rotate %4 by %c240_i32_39 dim 1 : vector<1x256xf32>, i32 -> vector<1x256xf32>
    %c15_i32_40 = arith.constant 15 : i32
    %278 = vector.broadcast %c15_i32_40 : i32 to vector<1x256xi32>
    %279 = arith.cmpi slt, %5, %278 : vector<1x256xi32>
    %cst_41 = arith.constant 0.000000e+00 : f32
    %280 = vector.broadcast %cst_41 : f32 to vector<1x256xf32>
    %281 = arith.select %279, %277, %280 : vector<1x256xi1>, vector<1x256xf32>
    %c224_i32_42 = arith.constant 224 : i32
    %282 = tpu.dynamic_rotate %4 by %c224_i32_42 dim 1 : vector<1x256xf32>, i32 -> vector<1x256xf32>
    %c14_i32_43 = arith.constant 14 : i32
    %283 = vector.broadcast %c14_i32_43 : i32 to vector<1x256xi32>
    %284 = arith.cmpi slt, %5, %283 : vector<1x256xi32>
    %cst_44 = arith.constant 0.000000e+00 : f32
    %285 = vector.broadcast %cst_44 : f32 to vector<1x256xf32>
    %286 = arith.select %284, %282, %285 : vector<1x256xi1>, vector<1x256xf32>
    %c208_i32_45 = arith.constant 208 : i32
    %287 = tpu.dynamic_rotate %4 by %c208_i32_45 dim 1 : vector<1x256xf32>, i32 -> vector<1x256xf32>
    %c13_i32_46 = arith.constant 13 : i32
    %288 = vector.broadcast %c13_i32_46 : i32 to vector<1x256xi32>
    %289 = arith.cmpi slt, %5, %288 : vector<1x256xi32>
    %cst_47 = arith.constant 0.000000e+00 : f32
    %290 = vector.broadcast %cst_47 : f32 to vector<1x256xf32>
    %291 = arith.select %289, %287, %290 : vector<1x256xi1>, vector<1x256xf32>
    %c49 = arith.constant 49 : index
    %292 = memref.load %arg3[%c49] : memref<98xf32, #tpu.memory_space<smem>>
    %293 = vector.broadcast %292 : f32 to vector<1x256xf32>
    %294 = arith.mulf %266, %293 : vector<1x256xf32>
    %c56 = arith.constant 56 : index
    %295 = memref.load %arg3[%c56] : memref<98xf32, #tpu.memory_space<smem>>
    %296 = vector.broadcast %295 : f32 to vector<1x256xf32>
    %297 = arith.mulf %271, %296 : vector<1x256xf32>
    %c63 = arith.constant 63 : index
    %298 = memref.load %arg3[%c63] : memref<98xf32, #tpu.memory_space<smem>>
    %299 = vector.broadcast %298 : f32 to vector<1x256xf32>
    %300 = arith.mulf %276, %299 : vector<1x256xf32>
    %c70 = arith.constant 70 : index
    %301 = memref.load %arg3[%c70] : memref<98xf32, #tpu.memory_space<smem>>
    %302 = vector.broadcast %301 : f32 to vector<1x256xf32>
    %303 = arith.mulf %4, %302 : vector<1x256xf32>
    %c77 = arith.constant 77 : index
    %304 = memref.load %arg3[%c77] : memref<98xf32, #tpu.memory_space<smem>>
    %305 = vector.broadcast %304 : f32 to vector<1x256xf32>
    %306 = arith.mulf %281, %305 : vector<1x256xf32>
    %c84 = arith.constant 84 : index
    %307 = memref.load %arg3[%c84] : memref<98xf32, #tpu.memory_space<smem>>
    %308 = vector.broadcast %307 : f32 to vector<1x256xf32>
    %309 = arith.mulf %286, %308 : vector<1x256xf32>
    %c91 = arith.constant 91 : index
    %310 = memref.load %arg3[%c91] : memref<98xf32, #tpu.memory_space<smem>>
    %311 = vector.broadcast %310 : f32 to vector<1x256xf32>
    %312 = arith.mulf %291, %311 : vector<1x256xf32>
    %313 = arith.addf %294, %297 : vector<1x256xf32>
    %314 = arith.addf %300, %303 : vector<1x256xf32>
    %315 = arith.addf %306, %309 : vector<1x256xf32>
    %316 = arith.addf %313, %314 : vector<1x256xf32>
    %317 = arith.addf %315, %312 : vector<1x256xf32>
    %318 = arith.addf %316, %317 : vector<1x256xf32>
    %c3_i32_48 = arith.constant 3 : i32
    %319 = tpu.dynamic_rotate %318 by %c3_i32_48 dim 1 : vector<1x256xf32>, i32 -> vector<1x256xf32>
    %c3_i32_49 = arith.constant 3 : i32
    %320 = vector.broadcast %c3_i32_49 : i32 to vector<1x256xi32>
    %321 = arith.cmpi sge, %6, %320 : vector<1x256xi32>
    %cst_50 = arith.constant 0.000000e+00 : f32
    %322 = vector.broadcast %cst_50 : f32 to vector<1x256xf32>
    %323 = arith.select %321, %319, %322 : vector<1x256xi1>, vector<1x256xf32>
    %c50 = arith.constant 50 : index
    %324 = memref.load %arg3[%c50] : memref<98xf32, #tpu.memory_space<smem>>
    %325 = vector.broadcast %324 : f32 to vector<1x256xf32>
    %326 = arith.mulf %266, %325 : vector<1x256xf32>
    %c57 = arith.constant 57 : index
    %327 = memref.load %arg3[%c57] : memref<98xf32, #tpu.memory_space<smem>>
    %328 = vector.broadcast %327 : f32 to vector<1x256xf32>
    %329 = arith.mulf %271, %328 : vector<1x256xf32>
    %c64 = arith.constant 64 : index
    %330 = memref.load %arg3[%c64] : memref<98xf32, #tpu.memory_space<smem>>
    %331 = vector.broadcast %330 : f32 to vector<1x256xf32>
    %332 = arith.mulf %276, %331 : vector<1x256xf32>
    %c71 = arith.constant 71 : index
    %333 = memref.load %arg3[%c71] : memref<98xf32, #tpu.memory_space<smem>>
    %334 = vector.broadcast %333 : f32 to vector<1x256xf32>
    %335 = arith.mulf %4, %334 : vector<1x256xf32>
    %c78 = arith.constant 78 : index
    %336 = memref.load %arg3[%c78] : memref<98xf32, #tpu.memory_space<smem>>
    %337 = vector.broadcast %336 : f32 to vector<1x256xf32>
    %338 = arith.mulf %281, %337 : vector<1x256xf32>
    %c85 = arith.constant 85 : index
    %339 = memref.load %arg3[%c85] : memref<98xf32, #tpu.memory_space<smem>>
    %340 = vector.broadcast %339 : f32 to vector<1x256xf32>
    %341 = arith.mulf %286, %340 : vector<1x256xf32>
    %c92 = arith.constant 92 : index
    %342 = memref.load %arg3[%c92] : memref<98xf32, #tpu.memory_space<smem>>
    %343 = vector.broadcast %342 : f32 to vector<1x256xf32>
    %344 = arith.mulf %291, %343 : vector<1x256xf32>
    %345 = arith.addf %326, %329 : vector<1x256xf32>
    %346 = arith.addf %332, %335 : vector<1x256xf32>
    %347 = arith.addf %338, %341 : vector<1x256xf32>
    %348 = arith.addf %345, %346 : vector<1x256xf32>
    %349 = arith.addf %347, %344 : vector<1x256xf32>
    %350 = arith.addf %348, %349 : vector<1x256xf32>
    %c2_i32_51 = arith.constant 2 : i32
    %351 = tpu.dynamic_rotate %350 by %c2_i32_51 dim 1 : vector<1x256xf32>, i32 -> vector<1x256xf32>
    %c2_i32_52 = arith.constant 2 : i32
    %352 = vector.broadcast %c2_i32_52 : i32 to vector<1x256xi32>
    %353 = arith.cmpi sge, %6, %352 : vector<1x256xi32>
    %cst_53 = arith.constant 0.000000e+00 : f32
    %354 = vector.broadcast %cst_53 : f32 to vector<1x256xf32>
    %355 = arith.select %353, %351, %354 : vector<1x256xi1>, vector<1x256xf32>
    %c51 = arith.constant 51 : index
    %356 = memref.load %arg3[%c51] : memref<98xf32, #tpu.memory_space<smem>>
    %357 = vector.broadcast %356 : f32 to vector<1x256xf32>
    %358 = arith.mulf %266, %357 : vector<1x256xf32>
    %c58 = arith.constant 58 : index
    %359 = memref.load %arg3[%c58] : memref<98xf32, #tpu.memory_space<smem>>
    %360 = vector.broadcast %359 : f32 to vector<1x256xf32>
    %361 = arith.mulf %271, %360 : vector<1x256xf32>
    %c65 = arith.constant 65 : index
    %362 = memref.load %arg3[%c65] : memref<98xf32, #tpu.memory_space<smem>>
    %363 = vector.broadcast %362 : f32 to vector<1x256xf32>
    %364 = arith.mulf %276, %363 : vector<1x256xf32>
    %c72 = arith.constant 72 : index
    %365 = memref.load %arg3[%c72] : memref<98xf32, #tpu.memory_space<smem>>
    %366 = vector.broadcast %365 : f32 to vector<1x256xf32>
    %367 = arith.mulf %4, %366 : vector<1x256xf32>
    %c79 = arith.constant 79 : index
    %368 = memref.load %arg3[%c79] : memref<98xf32, #tpu.memory_space<smem>>
    %369 = vector.broadcast %368 : f32 to vector<1x256xf32>
    %370 = arith.mulf %281, %369 : vector<1x256xf32>
    %c86 = arith.constant 86 : index
    %371 = memref.load %arg3[%c86] : memref<98xf32, #tpu.memory_space<smem>>
    %372 = vector.broadcast %371 : f32 to vector<1x256xf32>
    %373 = arith.mulf %286, %372 : vector<1x256xf32>
    %c93 = arith.constant 93 : index
    %374 = memref.load %arg3[%c93] : memref<98xf32, #tpu.memory_space<smem>>
    %375 = vector.broadcast %374 : f32 to vector<1x256xf32>
    %376 = arith.mulf %291, %375 : vector<1x256xf32>
    %377 = arith.addf %358, %361 : vector<1x256xf32>
    %378 = arith.addf %364, %367 : vector<1x256xf32>
    %379 = arith.addf %370, %373 : vector<1x256xf32>
    %380 = arith.addf %377, %378 : vector<1x256xf32>
    %381 = arith.addf %379, %376 : vector<1x256xf32>
    %382 = arith.addf %380, %381 : vector<1x256xf32>
    %c1_i32_54 = arith.constant 1 : i32
    %383 = tpu.dynamic_rotate %382 by %c1_i32_54 dim 1 : vector<1x256xf32>, i32 -> vector<1x256xf32>
    %c1_i32_55 = arith.constant 1 : i32
    %384 = vector.broadcast %c1_i32_55 : i32 to vector<1x256xi32>
    %385 = arith.cmpi sge, %6, %384 : vector<1x256xi32>
    %cst_56 = arith.constant 0.000000e+00 : f32
    %386 = vector.broadcast %cst_56 : f32 to vector<1x256xf32>
    %387 = arith.select %385, %383, %386 : vector<1x256xi1>, vector<1x256xf32>
    %c52 = arith.constant 52 : index
    %388 = memref.load %arg3[%c52] : memref<98xf32, #tpu.memory_space<smem>>
    %389 = vector.broadcast %388 : f32 to vector<1x256xf32>
    %390 = arith.mulf %266, %389 : vector<1x256xf32>
    %c59 = arith.constant 59 : index
    %391 = memref.load %arg3[%c59] : memref<98xf32, #tpu.memory_space<smem>>
    %392 = vector.broadcast %391 : f32 to vector<1x256xf32>
    %393 = arith.mulf %271, %392 : vector<1x256xf32>
    %c66 = arith.constant 66 : index
    %394 = memref.load %arg3[%c66] : memref<98xf32, #tpu.memory_space<smem>>
    %395 = vector.broadcast %394 : f32 to vector<1x256xf32>
    %396 = arith.mulf %276, %395 : vector<1x256xf32>
    %c73 = arith.constant 73 : index
    %397 = memref.load %arg3[%c73] : memref<98xf32, #tpu.memory_space<smem>>
    %398 = vector.broadcast %397 : f32 to vector<1x256xf32>
    %399 = arith.mulf %4, %398 : vector<1x256xf32>
    %c80 = arith.constant 80 : index
    %400 = memref.load %arg3[%c80] : memref<98xf32, #tpu.memory_space<smem>>
    %401 = vector.broadcast %400 : f32 to vector<1x256xf32>
    %402 = arith.mulf %281, %401 : vector<1x256xf32>
    %c87 = arith.constant 87 : index
    %403 = memref.load %arg3[%c87] : memref<98xf32, #tpu.memory_space<smem>>
    %404 = vector.broadcast %403 : f32 to vector<1x256xf32>
    %405 = arith.mulf %286, %404 : vector<1x256xf32>
    %c94 = arith.constant 94 : index
    %406 = memref.load %arg3[%c94] : memref<98xf32, #tpu.memory_space<smem>>
    %407 = vector.broadcast %406 : f32 to vector<1x256xf32>
    %408 = arith.mulf %291, %407 : vector<1x256xf32>
    %409 = arith.addf %390, %393 : vector<1x256xf32>
    %410 = arith.addf %396, %399 : vector<1x256xf32>
    %411 = arith.addf %402, %405 : vector<1x256xf32>
    %412 = arith.addf %409, %410 : vector<1x256xf32>
    %413 = arith.addf %411, %408 : vector<1x256xf32>
    %414 = arith.addf %412, %413 : vector<1x256xf32>
    %c53 = arith.constant 53 : index
    %415 = memref.load %arg3[%c53] : memref<98xf32, #tpu.memory_space<smem>>
    %416 = vector.broadcast %415 : f32 to vector<1x256xf32>
    %417 = arith.mulf %266, %416 : vector<1x256xf32>
    %c60 = arith.constant 60 : index
    %418 = memref.load %arg3[%c60] : memref<98xf32, #tpu.memory_space<smem>>
    %419 = vector.broadcast %418 : f32 to vector<1x256xf32>
    %420 = arith.mulf %271, %419 : vector<1x256xf32>
    %c67 = arith.constant 67 : index
    %421 = memref.load %arg3[%c67] : memref<98xf32, #tpu.memory_space<smem>>
    %422 = vector.broadcast %421 : f32 to vector<1x256xf32>
    %423 = arith.mulf %276, %422 : vector<1x256xf32>
    %c74 = arith.constant 74 : index
    %424 = memref.load %arg3[%c74] : memref<98xf32, #tpu.memory_space<smem>>
    %425 = vector.broadcast %424 : f32 to vector<1x256xf32>
    %426 = arith.mulf %4, %425 : vector<1x256xf32>
    %c81 = arith.constant 81 : index
    %427 = memref.load %arg3[%c81] : memref<98xf32, #tpu.memory_space<smem>>
    %428 = vector.broadcast %427 : f32 to vector<1x256xf32>
    %429 = arith.mulf %281, %428 : vector<1x256xf32>
    %c88 = arith.constant 88 : index
    %430 = memref.load %arg3[%c88] : memref<98xf32, #tpu.memory_space<smem>>
    %431 = vector.broadcast %430 : f32 to vector<1x256xf32>
    %432 = arith.mulf %286, %431 : vector<1x256xf32>
    %c95 = arith.constant 95 : index
    %433 = memref.load %arg3[%c95] : memref<98xf32, #tpu.memory_space<smem>>
    %434 = vector.broadcast %433 : f32 to vector<1x256xf32>
    %435 = arith.mulf %291, %434 : vector<1x256xf32>
    %436 = arith.addf %417, %420 : vector<1x256xf32>
    %437 = arith.addf %423, %426 : vector<1x256xf32>
    %438 = arith.addf %429, %432 : vector<1x256xf32>
    %439 = arith.addf %436, %437 : vector<1x256xf32>
    %440 = arith.addf %438, %435 : vector<1x256xf32>
    %441 = arith.addf %439, %440 : vector<1x256xf32>
    %c255_i32_57 = arith.constant 255 : i32
    %442 = tpu.dynamic_rotate %441 by %c255_i32_57 dim 1 : vector<1x256xf32>, i32 -> vector<1x256xf32>
    %c15_i32_58 = arith.constant 15 : i32
    %443 = vector.broadcast %c15_i32_58 : i32 to vector<1x256xi32>
    %444 = arith.cmpi slt, %6, %443 : vector<1x256xi32>
    %cst_59 = arith.constant 0.000000e+00 : f32
    %445 = vector.broadcast %cst_59 : f32 to vector<1x256xf32>
    %446 = arith.select %444, %442, %445 : vector<1x256xi1>, vector<1x256xf32>
    %c54 = arith.constant 54 : index
    %447 = memref.load %arg3[%c54] : memref<98xf32, #tpu.memory_space<smem>>
    %448 = vector.broadcast %447 : f32 to vector<1x256xf32>
    %449 = arith.mulf %266, %448 : vector<1x256xf32>
    %c61 = arith.constant 61 : index
    %450 = memref.load %arg3[%c61] : memref<98xf32, #tpu.memory_space<smem>>
    %451 = vector.broadcast %450 : f32 to vector<1x256xf32>
    %452 = arith.mulf %271, %451 : vector<1x256xf32>
    %c68 = arith.constant 68 : index
    %453 = memref.load %arg3[%c68] : memref<98xf32, #tpu.memory_space<smem>>
    %454 = vector.broadcast %453 : f32 to vector<1x256xf32>
    %455 = arith.mulf %276, %454 : vector<1x256xf32>
    %c75 = arith.constant 75 : index
    %456 = memref.load %arg3[%c75] : memref<98xf32, #tpu.memory_space<smem>>
    %457 = vector.broadcast %456 : f32 to vector<1x256xf32>
    %458 = arith.mulf %4, %457 : vector<1x256xf32>
    %c82 = arith.constant 82 : index
    %459 = memref.load %arg3[%c82] : memref<98xf32, #tpu.memory_space<smem>>
    %460 = vector.broadcast %459 : f32 to vector<1x256xf32>
    %461 = arith.mulf %281, %460 : vector<1x256xf32>
    %c89 = arith.constant 89 : index
    %462 = memref.load %arg3[%c89] : memref<98xf32, #tpu.memory_space<smem>>
    %463 = vector.broadcast %462 : f32 to vector<1x256xf32>
    %464 = arith.mulf %286, %463 : vector<1x256xf32>
    %c96 = arith.constant 96 : index
    %465 = memref.load %arg3[%c96] : memref<98xf32, #tpu.memory_space<smem>>
    %466 = vector.broadcast %465 : f32 to vector<1x256xf32>
    %467 = arith.mulf %291, %466 : vector<1x256xf32>
    %468 = arith.addf %449, %452 : vector<1x256xf32>
    %469 = arith.addf %455, %458 : vector<1x256xf32>
    %470 = arith.addf %461, %464 : vector<1x256xf32>
    %471 = arith.addf %468, %469 : vector<1x256xf32>
    %472 = arith.addf %470, %467 : vector<1x256xf32>
    %473 = arith.addf %471, %472 : vector<1x256xf32>
    %c254_i32_60 = arith.constant 254 : i32
    %474 = tpu.dynamic_rotate %473 by %c254_i32_60 dim 1 : vector<1x256xf32>, i32 -> vector<1x256xf32>
    %c14_i32_61 = arith.constant 14 : i32
    %475 = vector.broadcast %c14_i32_61 : i32 to vector<1x256xi32>
    %476 = arith.cmpi slt, %6, %475 : vector<1x256xi32>
    %cst_62 = arith.constant 0.000000e+00 : f32
    %477 = vector.broadcast %cst_62 : f32 to vector<1x256xf32>
    %478 = arith.select %476, %474, %477 : vector<1x256xi1>, vector<1x256xf32>
    %c55 = arith.constant 55 : index
    %479 = memref.load %arg3[%c55] : memref<98xf32, #tpu.memory_space<smem>>
    %480 = vector.broadcast %479 : f32 to vector<1x256xf32>
    %481 = arith.mulf %266, %480 : vector<1x256xf32>
    %c62 = arith.constant 62 : index
    %482 = memref.load %arg3[%c62] : memref<98xf32, #tpu.memory_space<smem>>
    %483 = vector.broadcast %482 : f32 to vector<1x256xf32>
    %484 = arith.mulf %271, %483 : vector<1x256xf32>
    %c69 = arith.constant 69 : index
    %485 = memref.load %arg3[%c69] : memref<98xf32, #tpu.memory_space<smem>>
    %486 = vector.broadcast %485 : f32 to vector<1x256xf32>
    %487 = arith.mulf %276, %486 : vector<1x256xf32>
    %c76 = arith.constant 76 : index
    %488 = memref.load %arg3[%c76] : memref<98xf32, #tpu.memory_space<smem>>
    %489 = vector.broadcast %488 : f32 to vector<1x256xf32>
    %490 = arith.mulf %4, %489 : vector<1x256xf32>
    %c83 = arith.constant 83 : index
    %491 = memref.load %arg3[%c83] : memref<98xf32, #tpu.memory_space<smem>>
    %492 = vector.broadcast %491 : f32 to vector<1x256xf32>
    %493 = arith.mulf %281, %492 : vector<1x256xf32>
    %c90 = arith.constant 90 : index
    %494 = memref.load %arg3[%c90] : memref<98xf32, #tpu.memory_space<smem>>
    %495 = vector.broadcast %494 : f32 to vector<1x256xf32>
    %496 = arith.mulf %286, %495 : vector<1x256xf32>
    %c97 = arith.constant 97 : index
    %497 = memref.load %arg3[%c97] : memref<98xf32, #tpu.memory_space<smem>>
    %498 = vector.broadcast %497 : f32 to vector<1x256xf32>
    %499 = arith.mulf %291, %498 : vector<1x256xf32>
    %500 = arith.addf %481, %484 : vector<1x256xf32>
    %501 = arith.addf %487, %490 : vector<1x256xf32>
    %502 = arith.addf %493, %496 : vector<1x256xf32>
    %503 = arith.addf %500, %501 : vector<1x256xf32>
    %504 = arith.addf %502, %499 : vector<1x256xf32>
    %505 = arith.addf %503, %504 : vector<1x256xf32>
    %c253_i32_63 = arith.constant 253 : i32
    %506 = tpu.dynamic_rotate %505 by %c253_i32_63 dim 1 : vector<1x256xf32>, i32 -> vector<1x256xf32>
    %c13_i32_64 = arith.constant 13 : i32
    %507 = vector.broadcast %c13_i32_64 : i32 to vector<1x256xi32>
    %508 = arith.cmpi slt, %6, %507 : vector<1x256xi32>
    %cst_65 = arith.constant 0.000000e+00 : f32
    %509 = vector.broadcast %cst_65 : f32 to vector<1x256xf32>
    %510 = arith.select %508, %506, %509 : vector<1x256xi1>, vector<1x256xf32>
    %511 = arith.addf %323, %355 : vector<1x256xf32>
    %512 = arith.addf %387, %414 : vector<1x256xf32>
    %513 = arith.addf %446, %478 : vector<1x256xf32>
    %514 = arith.addf %511, %512 : vector<1x256xf32>
    %515 = arith.addf %513, %510 : vector<1x256xf32>
    %516 = arith.addf %514, %515 : vector<1x256xf32>
    %517 = arith.addf %261, %516 : vector<1x256xf32>
    %518 = arith.negf %517 : vector<1x256xf32>
    %519 = math.exp %518 : vector<1x256xf32>
    %cst_66 = arith.constant 1.000000e+00 : f32
    %520 = vector.broadcast %cst_66 : f32 to vector<1x256xf32>
    %521 = arith.addf %520, %519 : vector<1x256xf32>
    %522 = arith.divf %520, %521 : vector<1x256xf32>
    %523 = vector.shape_cast %522 : vector<1x256xf32> to vector<1x1x256xf32>
    %c0_67 = arith.constant 0 : index
    %c0_68 = arith.constant 0 : index
    %c0_69 = arith.constant 0 : index
    %524 = vector.load %arg4[%c0_67, %c0_68, %c0_69] : memref<1x1x256xf32, #tpu.memory_space<vmem>>, vector<1x1x256xf32>
    tpu.vector_store %arg4[%c0_67, %c0_68, %c0_69], %523 {strides = array<i32>} : memref<1x1x256xf32, #tpu.memory_space<vmem>>, vector<1x1x256xf32>,
    return
  }
  func.func @transform_0(%arg0: i32) -> (i32, i32, i32) {
    %c0_i32 = arith.constant 0 : i32
    %c0_i32_0 = arith.constant 0 : i32
    %c0_i32_1 = arith.constant 0 : i32
    return %arg0, %c0_i32, %c0_i32_0 : i32, i32, i32
  }
  func.func @transform_1(%arg0: i32) -> (i32, i32) {
    %c0_i32 = arith.constant 0 : i32
    %c0_i32_0 = arith.constant 0 : i32
    %c0_i32_1 = arith.constant 0 : i32
    return %c0_i32, %c0_i32_0 : i32, i32
  }
  func.func @transform_2(%arg0: i32) -> i32 {
    %c0_i32 = arith.constant 0 : i32
    %c0_i32_0 = arith.constant 0 : i32
    return %c0_i32 : i32
  }
  func.func @transform_3(%arg0: i32) -> (i32, i32, i32) {
    %c0_i32 = arith.constant 0 : i32
    %c0_i32_0 = arith.constant 0 : i32
    %c0_i32_1 = arith.constant 0 : i32
    return %arg0, %c0_i32, %c0_i32_0 : i32, i32, i32
  }
}

</mosaic_0001>

<bundles_post_ra>
// kernel: tpu_custom_call.1
= control target key start
LH: loop header
LB: loop body
LE: loop exit
PB: predicated region body
PF: predicated region fallthrough
CT: control target
= control target key end

     0   :  { %s3585_s0 = inlined_call_operand.hbm [shape: f32[2,4,256], index: 0, kind: input, shape index: {}]   ;;  %s3586_s1 = inlined_call_operand.hbm [shape: s32[2,256], index: 1, kind: input, shape index: {}]   ;;  %s3587_s2 = inlined_call_operand.vmem [shape: f32[98], index: 2, kind: input, shape index: {}]   ;;  %s3588_s3 = inlined_call_operand.hbm [shape: f32[2,1,256], index: 3, kind: output, shape index: {}]  }
   0x1   :  { %3664 = sst [smem:[#allocation77_spill]] %s3585_s0 }
   0x2   :  { %3665 = sst [smem:[#allocation78_spill]] %s3586_s1 }
   0x3   :  { %3666 = sst [smem:[#allocation79_spill]] %s3587_s2 }
   0x4   :  { %3667 = sst [smem:[#allocation80_spill]] %s3588_s3 }
   0x5   :  { %8 = vsyncpa [#allocation3], 0 }
   0x6   :  { %10 = vsyncpa [#allocation3 + $0x1], 0 }
   0x7   :  { %11 = vsyncpa [#allocation7], 0 }
   0x8   :  { %12 = vsyncpa [#allocation5], 0 }
   0x9   :  { %13 = vsyncpa [#allocation4], 0 }
   0xa   :  { %15 = vsyncpa [#allocation4 + $0x1], 0  ;;  %s2174_s12 = smov 0   ;;  %s2176_s13 = smov 0  }
   0xb   :  { %s2178_s14 = smov 0   ;;  %s2180_s15 = smov 0  }
   0xc LB: > { %3668 = sst [smem:[#allocation14_spill]] %s2123_s12  ;;  %s2195_s16 = sadd.s32 4294967295, %s2135_s15   ;;  %s2135_s15 = sphi %s2180_s15, %s3890_s15   ;;  %s2131_s14 = sphi %s2178_s14, %s3893_s14   ;;  %s2127_s13 = sphi %s2176_s13, %s3892_s13   ;;  %s2123_s12 = sphi %s2174_s12, %s3891_s12  }
   0xd   : > { %3669 = sst [smem:[#allocation15_spill]] %s2127_s13  ;;  %s1785_s17 = sadd.s32 4294967294, %s2135_s15  }
   0xe   : > { %3670 = sst [smem:[#allocation16_spill]] %s2131_s14  ;;  %p41_p0 = scmp.ne.s32.totalorder %s2127_s13, %s2123_s12 }
   0xf   : > { %3671 = sst [smem:[#allocation17_spill]] %s2135_s15  ;;  %p3589_p1 = scmp.eq.s32.totalorder %s2195_s16, 0 }
  0x10   : > { %3672 = sst [smem:[#allocation18_spill]] %s2195_s16  ;;  %p113_p3 = scmp.eq.s32.totalorder %s1785_s17, 1 }
  0x11   : > { %p2204_p4 = por %p3589_p1, %p41_p0  ;;  %p1786_p5 = scmp.ge.s32.totalorder %s2135_s15, 1 }
  0x12   : > { %p2209_p6 = por %p113_p3, %p41_p0  ;;  %p120_p7 = scmp.lt.s32.totalorder %s2135_s15, 3 }
  0x13   : > { %s3673_s18 = scalar_select %p2204_p4, 1, 0 }
  0x14   : > { %s3674_s19 = scalar_select %p2209_p6, 1, 0 }
  0x15   : > { %p2214_p8 = pnand %p1786_p5, %p120_p7  ;;  %s2137_s21 = smov [#allocation6]  }
  0x16   : > { %3675 = sst [smem:[#allocation19_spill]] %s3674_s19  ;;  %s133_s22 = sshll.u32 %s2137_s21, 4  ;;  %s134_s22 = int_to_ptr.vmem [resolvable:$true] %s133_s22 }
  0x17   : > { %s3676_s20 = scalar_select %p2214_p8, 1, 0 }
  0x18   : > { %p1915_p10 = pneg %p2214_p8  ;;  %s3677_s2 = sld [smem:[#allocation79_spill]] }
  0x19   : > { %s2233_s27 = sadd.s32 1, %s2135_s15   ;;  %s3680_s1 = sld [smem:[#allocation78_spill]] }
  0x1a   : > { %p2228_p11 = pnand %p1915_p10, %p3589_p1  ;;  %3679 = sst [smem:[#allocation20_spill]] %s2233_s27 }
  0x1b   : > { %s25_s28 = ssub.s32 %s2135_s15, %s2233_s27 }
  0x1c   : > { %p1990_p13 = pneg %p2228_p11 }
  0x1e   : > { %s144_s25 = sshll.u32 %s3677_s2, 4  ;;  %s2224_s25 = int_to_ptr.vmem [resolvable:$true] %s144_s25 }
  0x1f   : > { %s1988_s4 = scalar_lea.hbm %s3680_s1, 64 }
  0x20   : > { %p1989_p12 = scmp.ne.s32.totalorder %s3680_s1, %s1988_s4  ;;  %p1995_p5 = scmp.lt.u32.totalorder %s1988_s4, %s3680_s1 }
  0x22   : > { %p1991_p0 = pnand %p1990_p13, %p1989_p12 }
  0x24   : > { %p1992_p3 = pneg %p1991_p0 }
  0x26   : > { %p1997_p7 = pnand %p1995_p5, %p1992_p3 }
  0x28   : > { %2000 = shalt.err (!%p1997_p7)
}
  0x29   : > { %s2001_s9 = scalar_lea.vmem %s134_s22, 64  ;;  %p2009_p2 = scmp.lt.s32.totalorder %s134_s22, %s134_s22 }
  0x2a   : > { %p2002_p10 = scmp.ne.s32.totalorder %s134_s22, %s2001_s9  ;;  %p2010_p6 = scmp.lt.s32.totalorder %s2001_s9, %s2001_s9 }
  0x2c   : > { %p2004_p9 = pnand %p2002_p10, %p1990_p13  ;;  %p2011_p4 = por %p2010_p6, %p2009_p2 }
  0x2e   : > { %p2005_p1 = pneg %p2004_p9 }
  0x30   : > { %p2012_p8 = pnand %p2011_p4, %p2005_p1 }
  0x32   : > { %2015 = shalt.err (!%p2012_p8)
}
  0x33   : > { %1918 = dma.hbm_to_vmem [thread:$0]  (!%p2228_p11), %s3680_s1, 64, %s134_s22, [#allocation7]  }
  0x34   : > { %s2016_s17 = scalar_lea.vmem %s2224_s25, 16  ;;  %p2024_p2 = scmp.lt.s32.totalorder %s2224_s25, %s2224_s25 }
  0x35   : > { %p2017_p12 = scmp.ne.s32.totalorder %s2224_s25, %s2016_s17  ;;  %p2025_p1 = scmp.lt.s32.totalorder %s2016_s17, %s2016_s17 }
  0x37   : > { %p2019_p9 = pnand %p2017_p12, %p1990_p13  ;;  %p2026_p4 = por %p2025_p1, %p2024_p2 }
  0x39   : > { %p2020_p0 = pneg %p2019_p9 }
  0x3b   : > { %p2027_p6 = pnand %p2026_p4, %p2020_p0 }
  0x3d   : > { %2030 = shalt.err (!%p2027_p6)
}
  0x3e   : > { %s2138_s21 = smov [#allocation8]   ;;  %p26_p8 = scmp.eq.s32.totalorder %s25_s28, 0 }
  0x3f   : > { %1921 = dma.vmem_to_smem (!%p2228_p11), %s2224_s25, 16, %s2138_s21, [#allocation5]  }
  0x40   : > { %s28_s22 = sadd.s32 1, %s2131_s14  ;;  %p35_p13 = scmp.ne.s32.totalorder %s2131_s14, %s2127_s13 }
  0x41   : > { %p36_p3 = scmp.eq.s32.totalorder %s2135_s15, 0  ;;  %p3682_p7 = scmp.eq.s32.totalorder %s2195_s16, 1 }
  0x42   : > { %s2277_s23 = scalar_select %p26_p8, %s2131_s14, %s28_s22  }
  0x43   : > { %p37_p5 = por %p36_p3, %p35_p13  ;;  %p2281_p10 = por %p3682_p7, %p35_p13 }
  0x44   : > { %3681 = sst [smem:[#allocation21_spill]] %s2277_s23  ;;  %p1932_p12 = scmp.lt.s32.totalorder %s2135_s15, 2 }
  0x45   : > { %s3683_s24 = scalar_select %p2281_p10, 1, 0 }
  0x46   : > { %s155_s26 = sand.u32 1, %s2131_s14   ;;  %s1901_s30 = sshll.u32 %s2135_s15, 7 }
  0x47   : > { %3684 = sst [smem:[#allocation22_spill]] %s3683_s24  ;;  %s1790_s29 = sshll.u32 %s155_s26, 3 }
  0x48   : > { %s3685_s0 = sld [smem:[#allocation77_spill]]  ;;  %s159_s28 = scalar_lea.vmem [#allocation2], %s1790_s29 }
  0x49   : > { %s167_s6 = sshll.u32 %s159_s28, 4  ;;  %p2295_p11 = pnand %p1932_p12, %p37_p5  ;;  %s2293_s6 = int_to_ptr.vmem [resolvable:$true] %s167_s6 }
  0x4a   : > { %s156_s8 = scalar_lea.sflag [#allocation3], %s155_s26 }
  0x4b   : > { %p2033_p0 = pneg %p2295_p11 }
  0x4e   : > { %s2291_s25 = scalar_lea.hbm %s3685_s0, %s1901_s30  ;;  %s2036_s17 = scalar_lea.hbm %s3685_s0, 256 }
  0x4f   : > { %s2031_s9 = scalar_lea.hbm %s2291_s25, 128  ;;  %p2037_p4 = scmp.lt.u32.totalorder %s2291_s25, %s3685_s0 }
  0x50   : > { %p2032_p9 = scmp.ne.s32.totalorder %s2291_s25, %s2031_s9  ;;  %p2038_p6 = scmp.lt.u32.totalorder %s2036_s17, %s2031_s9 }
  0x51   : > { %p2040_p13 = scmp.lt.u32.totalorder %s2031_s9, %s2291_s25 }
  0x52   : > { %p2034_p2 = pnand %p2033_p0, %p2032_p9  ;;  %p2039_p8 = por %p2038_p6, %p2037_p4 }
  0x54   : > { %p2035_p1 = pneg %p2034_p2  ;;  %p2041_p3 = por %p2040_p13, %p2039_p8 }
  0x56   : > { %p2042_p5 = pnand %p2041_p3, %p2035_p1 }
  0x58   : > { %2045 = shalt.err (!%p2042_p5)
}
  0x59   : > { %s2046_s26 = scalar_lea.vmem %s2293_s6, 128  ;;  %s2139_s29 = smov [#allocation2]  }
  0x5a   : > { %p2047_p7 = scmp.ne.s32.totalorder %s2293_s6, %s2046_s26  ;;  %s2051_s30 = sshll.u32 %s2139_s29, 4  ;;  %s2052_s30 = int_to_ptr.vmem [resolvable:$false] %s2051_s30 }
  0x5b   : > { %s2053_s4 = scalar_lea.vmem %s2052_s30, 256  ;;  %p2054_p2 = scmp.lt.s32.totalorder %s2293_s6, %s2052_s30 }
  0x5c   : > { %p2049_p12 = pnand %p2047_p7, %p2033_p0  ;;  %p2055_p4 = scmp.lt.s32.totalorder %s2053_s4, %s2046_s26 }
  0x5e   : > { %p2050_p9 = pneg %p2049_p12  ;;  %p2056_p6 = por %p2055_p4, %p2054_p2 }
  0x60   : > { %p2057_p8 = pnand %p2056_p6, %p2050_p9 }
  0x62   : > { %2060 = shalt.err (!%p2057_p8)
}
  0x63   : > { %1925 = dma.hbm_to_vmem [thread:$0]  (!%p2295_p11), %s2291_s25, 128, %s2293_s6, %s156_s8  }
  0x64   : > { %p3687_p1 = scmp.ne.s32.totalorder %s3676_s20, 0 }
  0x66   : > { %176 = sbr.rel (%p3687_p1) target bundleno = 538 (0x21a), region = 32 }
  0x6d   : > { %s2327_s5 = sand.u32 1, %s2127_s13   ;;  %p3689_p0 = scmp.ne.s32.totalorder %s3673_s18, 0 }
  0x6e   : > { %3688 = sst [smem:[#allocation23_spill]] %s2327_s5  ;;  %s1794_s28 = sshll.u32 %s2327_s5, 3 }
  0x6f   : > { %s179_s9 = scalar_lea.sflag [#allocation3], %s2327_s5  ;;  %s182_s10 = scalar_lea.vmem [#allocation2], %s1794_s28 }
  0x70   : > { %2106 = dma.done.wait (%p3689_p0), %s179_s9, 128  }
  0x71   : > { %2108 = vsyncadd (%p3689_p0), %s179_s9, 4294967168  ;;  %p3690_p13 = scmp.eq.s32.totalorder %s2195_s16, 0 }
  0x73   : > { %2110 = dma.done.wait (%p3690_p13), [#allocation7], 64   ;;  %p3691_p11 = pmov %p3690_p13 }
  0x75   : > { %2112 = vsyncadd (%p3691_p11), [#allocation7], 4294967232  ;;  %p3692_p3 = pmov %p3691_p11 }
  0x77   : > { %2114 = dma.done.wait (%p3692_p3), [#allocation5], 16   ;;  %p3693_p5 = pmov %p3692_p3 }
  0x79   : > { %2116 = vsyncadd (%p3693_p5), [#allocation5], 4294967280 }
  0x7a   : > { %195 = sfence }
  0x7b   : > { %v214_v0 = vld [vmem:[%s182_s10] sm:$0xff]  ;;  %vm218_vm0 = vcmask 1043456   ;;  %s1800_s18 = sld [smem:[#allocation8 + $0x15]]  ;;  %s1807_s20 = sld [smem:[#allocation8 + $0x16]] }
  0x7c   : > { %v219_v1 = vsel %vm218_vm0, %v214_v0, 0.0  ;;  %v216_v2 = vcombine.high %v214_v0, %v214_v0  ;;  %v235_v10 = vsel %vm218_vm0, %v214_v0, -inf  ;;  %s1814_s25 = sld [smem:[#allocation8 + $0x17]]  ;;  %s2140_s6 = smov 32  }
  0x7d   : > { %v220_v3 = vrot.slane %v219_v1, 4  ;;  %v236_v16 = vrot.slane %v235_v10, 4  ;;  %s2141_s7 = smov 48   ;;  %s2142_s8 = smov 16  }
  0x7e   : > { %v226_v4 = vsel %vm218_vm0, %v216_v2, 0.0  ;;  %v242_v9 = vsel %vm218_vm0, %v216_v2, -inf  ;;  %s2379_s11 = sld [smem:[#allocation8 + $0x19]]  ;;  %s2143_s17 = smov 112  }
  0x7f   : > { %v221_v5 = vadd.f32 %v220_v3, %v219_v1  ;;  %v227_v6 = vrot.slane %v226_v4, 4  ;;  %v243_v15 = vrot.slane %v242_v9, 4  ;;  %v237_v22 = vmax.f32 %v235_v10, %v236_v16  ;;  %s1849_s21 = sld [smem:[#allocation8 + $0x46]]  ;;  %s1856_s22 = sld [smem:[#allocation8 + $0x47]] }
  0x80   : > { %s1863_s26 = sld [smem:[#allocation8 + $0x48]]  ;;  %s2144_s29 = smov 96  }
  0x81   : > { %v222_v7 = vrot.slane %v221_v5, 2  ;;  %v228_v8 = vadd.f32 %v227_v6, %v226_v4  ;;  %v244_v21 = vmax.f32 %v242_v9, %v243_v15  ;;  %v238_v25 = vrot.slane %v237_v22, 2  ;;  %s1877_s30 = sld [smem:[#allocation8 + $0x4a]]  ;;  %s1884_s4 = sld [smem:[#allocation8 + $0x4b]] }
  0x82   : > { %v426_v26 = vstv %s1800_s18  ;;  %v510_v29 = vstv %s1807_s20  ;;  %v594_v30 = vstv %s1814_s25  ;;  %s1835_s28 = sld [smem:[#allocation8 + $0x1a]]  ;;  %s1842_s9 = sld [smem:[#allocation8 + $0x1b]] }
  0x83   : > { %v223_v11 = vadd.f32 %v222_v7, %v221_v5  ;;  %v229_v12 = vrot.slane %v228_v8, 2  ;;  %v245_v24 = vrot.slane %v244_v21, 2  ;;  %v239_v38 = vmax.f32 %v237_v22, %v238_v25  ;;  %s2145_s10 = smov 80   ;;  %s1821_s18 = sld [smem:[#allocation8 + $0x18]] }
  0x84   : > { %v724_v44 = vstv %s2379_s11  ;;  %s1891_s20 = sld [smem:[#allocation8 + $0x4c]]  ;;  %s1870_s25 = sld [smem:[#allocation8 + $0x49]] }
  0x85   : > { %v224_v13 = vrot.slane %v223_v11, 1  ;;  %v230_v14 = vadd.f32 %v229_v12, %v228_v8  ;;  %v246_v37 = vmax.f32 %v244_v21, %v245_v24  ;;  %v240_v41 = vrot.slane %v239_v38, 1  ;;  %s2516_s11 = sld [smem:[#allocation8 + $0xe]]  ;;  %s2547_s0 = sld [smem:[#allocation8 + $0x39]] }
  0x86   : > { %v1132_v45 = vstv %s1849_s21  ;;  %v1214_v46 = vstv %s1856_s22  ;;  %v1296_v51 = vstv %s1863_s26  ;;  %s2520_s21 = sld [smem:[#allocation8 + $0xf]]  ;;  %s2522_s22 = sld [smem:[#allocation8 + $0x10]]  ;;  %v2146_v24 = vmov 1966171168  }
  0x87   : > { %v225_v17 = vadd.f32 %v224_v13, %v223_v11  ;;  %v231_v18 = vrot.slane %v230_v14, 1  ;;  %v247_v40 = vrot.slane %v246_v37, 1  ;;  %v2391_v43 = vmax.f32 %v239_v38, %v240_v41  ;;  %s2524_s26 = sld [smem:[#allocation8 + $0x1c]]  ;;  %s2549_s1 = sld [smem:[#allocation8 + $0x3a]] }
  0x88   : > { %v1424_v56 = vstv %s1877_s30  ;;  %v1506_v0 = vstv %s1884_s4  ;;  %v808_v4 = vstv %s1835_s28  ;;  %v892_v8 = vstv %s1842_s9  ;;  %s2528_s30 = sld [smem:[#allocation8 + $0x1d]]  ;;  %s2530_s4 = sld [smem:[#allocation8 + $0x1e]] }
  0x89   : > { %v2343_v19 = vmul.f32 0.25, %v225_v17  ;;  %v232_v20 = vadd.f32 %v231_v18, %v230_v14  ;;  %v2389_v42 = vmax.f32 %v246_v37, %v247_v40  ;;  %v2399_v47 = vmul.f32 %v1132_v45, %v2391_v43  ;;  %s2532_s28 = sld [smem:[#allocation8 + $0x31]]  ;;  %s2534_s9 = sld [smem:[#allocation8 + $0x20]] }
  0x8a   : > { %v2405_v49 = vmul.f32 %v1214_v46, %v2391_v43  ;;  %v2413_v53 = vmul.f32 %v1296_v51, %v2391_v43  ;;  %v2433_v60 = vmul.f32 %v1424_v56, %v2391_v43  ;;  %v2447_v1 = vmul.f32 %v1506_v0, %v2391_v43  ;;  %s2551_s2 = sld [smem:[#allocation8 + $0x3c]]  ;;  %s2553_s23 = sld [smem:[#allocation8 + $0x36]] }
  0x8b   : > { %281 = vrot.lane.b32.xlu1 %v2343_v19, %s2140_s6  ;;  %252 = vrot.lane.b32.xlu0 %v2343_v19, %s2141_s7  ;;  %v2349_v23 = vmul.f32 0.25, %v232_v20  ;;  %v2352_v27 = vmul.f32 %v426_v26, %v2343_v19  ;;  %v2362_v31 = vmul.f32 %v510_v29, %v2343_v19  ;;  %v2370_v34 = vmul.f32 %v594_v30, %v2343_v19  ;;  %3697 = sst [smem:[#allocation27_spill]] %s2516_s11  ;;  %s2555_s14 = sld [smem:[#allocation8 + $0x3f]] }
  0x8c   : > { %v2402_v48 = vmul.f32 %v1132_v45, %v2389_v42  ;;  %v2408_v50 = vmul.f32 %v1214_v46, %v2389_v42  ;;  %v2416_v54 = vmul.f32 %v1296_v51, %v2389_v42  ;;  %v2425_v57 = vmul.f32 %v724_v44, %v2343_v19  ;;  %3699 = sst [smem:[#allocation29_spill]] %s2520_s21  ;;  %s2557_s13 = sld [smem:[#allocation8 + $0x3d]] }
  0x8d   : > { %v2355_v28 = vmul.f32 %v426_v26, %v2349_v23  ;;  %v2365_v32 = vmul.f32 %v510_v29, %v2349_v23  ;;  %v2373_v35 = vmul.f32 %v594_v30, %v2349_v23  ;;  %v2428_v58 = vmul.f32 %v724_v44, %v2349_v23  ;;  %3700 = sst [smem:[#allocation30_spill]] %s2522_s22  ;;  %s2561_s15 = sld [smem:[#allocation8 + $0x41]] }
  0x8e   : > { %v1147_v52 = vcombine.low %v2399_v47, %v2402_v48  ;;  %v1229_v55 = vcombine.low %v2405_v49, %v2408_v50  ;;  %v1311_v59 = vcombine.low %v2413_v53, %v2416_v54  ;;  %v2436_v61 = vmul.f32 %v1424_v56, %v2389_v42  ;;  %3701 = sst [smem:[#allocation31_spill]] %s2524_s26  ;;  %s2559_s27 = sld [smem:[#allocation8 + $0x40]] }
  0x8f   : > { %308 = vrot.lane.b32.xlu0 %v2343_v19, %s2142_s8  ;;  %283 = vrot.lane.b32.xlu1 %v2349_v23, %s2140_s6  ;;  %v441_v33 = vcombine.low %v2352_v27, %v2355_v28  ;;  %v525_v36 = vcombine.low %v2362_v31, %v2365_v32  ;;  %v609_v39 = vcombine.low %v2370_v34, %v2373_v35  ;;  %v678_v12 = vstv %s1821_s18  ;;  %3703 = sst [smem:[#allocation33_spill]] %s2528_s30  ;;  %s2568_s12 = sld [smem:[#allocation8]] }
  0x90   : > { %v1439_v62 = vcombine.low %v2433_v60, %v2436_v61  ;;  %v739_v63 = vcombine.low %v2425_v57, %v2428_v58  ;;  %v2450_v2 = vmul.f32 %v1506_v0, %v2389_v42  ;;  %v2463_v5 = vmul.f32 %v808_v4, %v2343_v19  ;;  %3704 = sst [smem:[#allocation34_spill]] %s2530_s4  ;;  %s2538_s18 = sld [smem:[#allocation8 + $0x33]] }
  0x91   : > { %v2466_v6 = vmul.f32 %v808_v4, %v2349_v23  ;;  %v2479_v9 = vmul.f32 %v892_v8, %v2343_v19  ;;  %v2482_v10 = vmul.f32 %v892_v8, %v2349_v23  ;;  %v2487_v13 = vmul.f32 %v678_v12, %v2343_v19  ;;  %3705 = sst [smem:[#allocation35_spill]] %s2532_s28  ;;  %s2566_s19 = sld [smem:[#allocation8 + $0x43]] }
  0x92   : > { %v1521_v3 = vcombine.low %v2447_v1, %v2450_v2  ;;  %v2490_v14 = vmul.f32 %v678_v12, %v2349_v23  ;;  %v1588_v16 = vstv %s1891_s20  ;;  %v1378_v17 = vstv %s1870_s25  ;;  %3706 = sst [smem:[#allocation36_spill]] %s2534_s9  ;;  %s2540_s20 = sld [smem:[#allocation8 + $0x38]] }
  0x93   : > { %335 = vrot.lane.b32.xlu0 %v2343_v19, %s2143_s17  ;;  %310 = vrot.lane.b32.xlu1 %v2349_v23, %s2142_s8  ;;  %v823_v7 = vcombine.low %v2463_v5, %v2466_v6  ;;  %v907_v11 = vcombine.low %v2479_v9, %v2482_v10  ;;  %v2495_v18 = vmul.f32 %v1588_v16, %v2391_v43  ;;  %v266_v25 = vunpack.c.l.s4 %v2146_v24  ;;  %s2542_s25 = sld [smem:[#allocation8 + $0x35]]  ;;  %3711 = sst [smem:[#allocation41_spill]] %s2547_s0 }
  0x94   : > { %v693_v15 = vcombine.low %v2487_v13, %v2490_v14  ;;  %v2498_v20 = vmul.f32 %v1588_v16, %v2389_v42  ;;  %v2501_v21 = vmul.f32 %v1378_v17, %v2391_v43  ;;  %v3619_v26 = vlaneseq  ;;  %3712 = sst [smem:[#allocation42_spill]] %s2549_s1  ;;  %s2572_s24 = sld [smem:[#allocation8 + $0x23]]  ;;  %v2775_v16 = vld [vmem:[#allocation6] ss:$2 sm:$0x3] }
  0x95   : > { %v267_v29 = vunpack.c.0.s8 %v266_v25  ;;  %3713 = sst [smem:[#allocation43_spill]] %s2551_s2  ;;  %s2570_s3 = sld [smem:[#allocation8 + $0x44]]  ;;  %v507_v35 = vstv %s2520_s21  ;;  %v430_v46 = vstv %s2524_s26  ;;  %v514_v51 = vstv %s2528_s30 }
  0x96   : > { %v1603_v22 = vcombine.low %v2495_v18, %v2498_v20  ;;  %3708 = sst [smem:[#allocation38_spill]] %s2538_s18  ;;  %v2545_v30 = vshrl.u32 %v3619_v26, 7  ;;  %s2574_s16 = sld [smem:[#allocation8 + $0x4d]]  ;;  %v2599_v28 = vand.u32 127, %v3619_v26  ;;  %v598_v8 = vstv %s2530_s4 }
  0x97   : > { %362 = vrot.lane.b32.xlu0 %v2343_v19, %s2144_s29  ;;  %337 = vrot.lane.b32.xlu1 %v2349_v23, %s2143_s17  ;;  %3714 = sst [smem:[#allocation44_spill]] %s2553_s23  ;;  %s2582_s5 = sld [smem:[#allocation8 + $0x1]]  ;;  %v1129_v53 = vstv %s2555_s14  ;;  %vm288_vm6 = vcmp.ge.s32.totalorder %v2775_v16, 2  ;;  %vm315_vm7 = vcmp.ge.s32.totalorder %v2775_v16, 1  ;;  %vm342_vm8 = vcmp.lt.s32.totalorder %v2775_v16, 15 }
  0x98   : > { %3709 = sst [smem:[#allocation39_spill]] %s2540_s20  ;;  %v2564_v37 = vsub.s32 %v267_v29, %v2545_v30  ;;  %3727 = vst [vmem:[#allocation57_spill] sm:$0xff] %v2599_v28  ;;  %s2653_s30 = sld [smem:[#allocation8 + $0x27]]  ;;  %vm285_vm1 = vcmp.lt.s32.totalorder %v2599_v28, 32  ;;  %v1126_v24 = vstv %s2540_s20  ;;  %vm312_vm2 = vcmp.lt.s32.totalorder %v2599_v28, 16 }
  0x99   : > { %3710 = sst [smem:[#allocation40_spill]] %s2542_s25  ;;  %s2670_s9 = sld [smem:[#allocation8 + $0x58]]  ;;  %vm339_vm3 = vcmp.lt.s32.totalorder %v2599_v28, 112  ;;  %vm366_vm4 = vcmp.lt.s32.totalorder %v2599_v28, 96  ;;  %vm258_vm5 = vcmp.lt.s32.totalorder %v2599_v28, 48  ;;  %vm369_vm9 = vcmp.lt.s32.totalorder %v2775_v16, 14 }
  0x9a   : > { %3715 = sst [smem:[#allocation45_spill]] %s2555_s14  ;;  %v2580_v38 = vrot.slane %v441_v33, %v2564_v37  ;;  %v2596_v27 = vrot.slane %v525_v36, %v2564_v37  ;;  %v2609_v33 = vrot.slane %v609_v39, %v2564_v37  ;;  %v591_v39 = vstv %s2522_s22  ;;  %s2647_s22 = sld [smem:[#allocation8 + $0x56]] }
  0x9b   : > { %364 = vrot.lane.b32.xlu1 %v2349_v23, %s2144_s29  ;;  %254 = vrot.lane.b32.xlu0 %v2349_v23, %s2141_s7  ;;  %3716 = sst [smem:[#allocation46_spill]] %s2557_s13  ;;  %v2645_v4 = vrot.slane %v1147_v52, %v2564_v37  ;;  %v2662_v48 = vrot.slane %v1229_v55, %v2564_v37  ;;  %v2668_v52 = vrot.slane %v1311_v59, %v2564_v37  ;;  %s2672_s4 = sld [smem:[#allocation8 + $0x59]]  ;;  %vm261_vm10 = vcmp.ge.s32.totalorder %v2775_v16, 3 }
  0x9c   : > { %3717 = sst [smem:[#allocation47_spill]] %s2559_s27  ;;  %v455_v34 = vrot.slane %v2580_v38, %v2564_v37  ;;  %v539_v56 = vrot.slane %v2596_v27, %v2564_v37  ;;  %s2680_s28 = sld [smem:[#allocation8 + $0x13]]  ;;  %v2693_v59 = vrot.slane %v1439_v62, %v2564_v37  ;;  %v2737_v62 = vrot.slane %v1521_v3, %v2564_v37 }
  0x9d   : > { %3718 = sst [smem:[#allocation48_spill]] %s2561_s15  ;;  %s2695_s25 = sld [smem:[#allocation8 + $0x5]]  ;;  %v2748_v61 = vrot.slane %v739_v63, %v2564_v37  ;;  %v2831_v5 = vrot.slane %v907_v11, %v2564_v37  ;;  %v2867_v29 = vrot.slane %v693_v15, %v2564_v37  ;;  %vm393_vm11 = vcmp.lt.s32.totalorder %v2599_v28, 80 }
  0x9e   : > { %3719 = sst [smem:[#allocation49_spill]] %s2566_s19  ;;  %s2697_s0 = sld [smem:[#allocation8 + $0x21]]  ;;  %vm396_vm12 = vcmp.lt.s32.totalorder %v2775_v16, 13 }
  0x9f   : > { %974 = vrot.lane.b32.xlu1 %v2389_v42, %s2141_s7  ;;  %972 = vrot.lane.b32.xlu0 %v2391_v43, %s2141_s7  ;;  %s2512_s7 = sld [smem:[#allocation8 + $0x8]]  ;;  %3720 = sst [smem:[#allocation50_spill]] %s2568_s12  ;;  %3756 = vst [vmem:[#allocation74_spill] sm:$0xff] %v2831_v5 }
  0xa0   : > { %3721 = sst [smem:[#allocation51_spill]] %s2570_s3  ;;  %s2588_s12 = sld [smem:[#allocation8 + $0x4e]] }
  0xa1   : > { %3722 = sst [smem:[#allocation52_spill]] %s2572_s24  ;;  %s2590_s24 = sld [smem:[#allocation8 + $0x4f]] }
  0xa2   : > { %3723 = sst [smem:[#allocation53_spill]] %s2574_s16  ;;  %s2603_s3 = sld [smem:[#allocation8 + $0x24]] }
  0xa3   : > { %999 = vrot.lane.b32.xlu1 %v2389_v42, %s2140_s6  ;;  %997 = vrot.lane.b32.xlu0 %v2391_v43, %s2140_s6  ;;  %s2510_s6 = sld [smem:[#allocation8 + $0x7]]  ;;  %3724 = sst [smem:[#allocation54_spill]] %s2582_s5 }
  0xa4   : > { %s2601_s5 = sld [smem:[#allocation8 + $0x51]]  ;;  %3735 = sst [smem:[#allocation65_spill]] %s2670_s9 }
  0xa5   : > { %3695 = sst [smem:[#allocation25_spill]] %s2512_s7  ;;  %v504_v32 = vstv %s2512_s7  ;;  %s2706_s1 = sld [smem:[#allocation8 + $0x28]] }
  0xa6   : > { %3725 = sst [smem:[#allocation55_spill]] %s2588_s12  ;;  %s2615_s12 = sld [smem:[#allocation8 + $0x2]] }
  0xa7   : > { %1024 = vrot.lane.b32.xlu1 %v2389_v42, %s2142_s8  ;;  %1022 = vrot.lane.b32.xlu0 %v2391_v43, %s2142_s8  ;;  %s2514_s8 = sld [smem:[#allocation8 + $0x9]]  ;;  %3726 = sst [smem:[#allocation56_spill]] %s2590_s24 }
  0xa8   : > { %3729 = sst [smem:[#allocation59_spill]] %s2603_s3  ;;  %s2611_s24 = sld [smem:[#allocation8 + $0x52]] }
  0xa9   : > { %3694 = sst [smem:[#allocation24_spill]] %s2510_s6  ;;  %v420_v31 = vstv %s2510_s6  ;;  %s2626_s3 = sld [smem:[#allocation8 + $0x25]] }
  0xaa   : > { %3728 = sst [smem:[#allocation58_spill]] %s2601_s5  ;;  %s2619_s5 = sld [smem:[#allocation8 + $0x54]] }
  0xab   : > { %1049 = vrot.lane.b32.xlu1 %v2389_v42, %s2143_s17  ;;  %1047 = vrot.lane.b32.xlu0 %v2391_v43, %s2143_s17  ;;  %s2518_s17 = sld [smem:[#allocation8 + $0xb]]  ;;  %3734 = sst [smem:[#allocation64_spill]] %s2653_s30 }
  0xac   : > { %3731 = sst [smem:[#allocation61_spill]] %s2615_s12  ;;  %s2699_s26 = sld [smem:[#allocation8 + $0x5b]] }
  0xad   : > { %3696 = sst [smem:[#allocation26_spill]] %s2514_s8  ;;  %v588_v36 = vstv %s2514_s8  ;;  %s2632_s8 = sld [smem:[#allocation8 + $0x55]] }
  0xae   : > { %3730 = sst [smem:[#allocation60_spill]] %s2611_s24  ;;  %s2709_s14 = sld [smem:[#allocation8 + $0x5c]] }
  0xaf   : > { %1074 = vrot.lane.b32.xlu1 %v2389_v42, %s2144_s29  ;;  %1072 = vrot.lane.b32.xlu0 %v2391_v43, %s2144_s29  ;;  %s2526_s29 = sld [smem:[#allocation8 + $0x12]]  ;;  %3732 = sst [smem:[#allocation62_spill]] %s2626_s3 }
  0xb0   : > { %3736 = sst [smem:[#allocation66_spill]] %s2672_s4  ;;  %s2713_s21 = sld [smem:[#allocation8 + $0x5d]] }
  0xb1   : > { %3698 = sst [smem:[#allocation28_spill]] %s2518_s17  ;;  %s3747_s15 = sld [smem:[#allocation54_spill]] }
  0xb2   : > { %3737 = sst [smem:[#allocation67_spill]] %s2680_s28  ;;  %s3746_s23 = sld [smem:[#allocation52_spill]] }
  0xb3   : > { %391 = vrot.lane.b32.xlu1 %v2349_v23, %s2145_s10  ;;  %389 = vrot.lane.b32.xlu0 %v2343_v19, %s2145_s10  ;;  %v2504_v19 = vmul.f32 %v1378_v17, %v2389_v42  ;;  %3738 = sst [smem:[#allocation68_spill]] %s2695_s25  ;;  %s2722_s27 = sld [smem:[#allocation8 + $0x5f]]  ;;  %v2825_v17 = vsub.s32 0, %v2545_v30 }
  0xb4   : > { %3740 = sst [smem:[#allocation69_spill]] %s2697_s0  ;;  %s2725_s7 = sld [smem:[#allocation8 + $0x60]] }
  0xb5   : > { %v1393_v23 = vcombine.low %v2501_v21, %v2504_v19  ;;  %3702 = sst [smem:[#allocation32_spill]] %s2526_s29  ;;  %v721_v0 = vstv %s2526_s29  ;;  %s3744_s29 = sld [smem:[#allocation50_spill]]  ;;  %v2947_v19 = vrot.slane %v1603_v22, %v2564_v37 }
  0xb6   : > { %3743 = sst [smem:[#allocation70_spill]] %s2706_s1  ;;  %s3748_s6 = sld [smem:[#allocation59_spill]] }
  0xb7   : > { %1099 = vrot.lane.b32.xlu1 %v2389_v42, %s2145_s10  ;;  %1097 = vrot.lane.b32.xlu0 %v2391_v43, %s2145_s10  ;;  %s2536_s10 = sld [smem:[#allocation8 + $0x32]]  ;;  %v718_v42 = vstv %s2518_s17  ;;  %v423_v43 = vstv %s2516_s11  ;;  %s2638_s17 = sld [smem:[#allocation8 + $0x4]] }
  0xb8   : > { %s2740_s2 = sld [smem:[#allocation8 + $0x2a]]  ;;  %s2742_s13 = sld [smem:[#allocation8 + $0x2b]]  ;;  %v433_v2 = vstv %s3746_s23 }
  0xb9   : > { %s2754_s19 = sld [smem:[#allocation8 + $0x2c]]  ;;  %s2756_s20 = sld [smem:[#allocation8 + $0xd]] }
  0xba   : > { %s2763_s18 = sld [smem:[#allocation8 + $0x14]]  ;;  %s2765_s16 = sld [smem:[#allocation8 + $0xa]] }
  0xbb   : > { %v417_v47 = vstv %s3744_s29  ;;  %s2771_s24 = sld [smem:[#allocation8 + $0x22]]  ;;  %s2773_s11 = sld [smem:[#allocation8 + $0x11]] }
  0xbc   : > { %s2789_s30 = sld [smem:[#allocation8 + $0x6]]  ;;  %s2805_s12 = sld [smem:[#allocation8 + $0x3]] }
  0xbd   : > { %3707 = sst [smem:[#allocation37_spill]] %s2536_s10  ;;  %s2678_s10 = sld [smem:[#allocation8 + $0xc]] }
  0xbe   : > { %3733 = sst [smem:[#allocation63_spill]] %s2638_s17  ;;  %s2791_s17 = sld [smem:[#allocation8 + $0x29]] }
  0xbf   : > { %3749 = sst [smem:[#allocation50_spill]] %s2756_s20  ;;  %s2801_s3 = sld [smem:[#allocation8 + $0x2e]] }
  0xc0   : > { %3750 = sst [smem:[#allocation52_spill]] %s2763_s18  ;;  %s2810_s4 = sld [smem:[#allocation8 + $0x2f]] }
  0xc1   : > { %3751 = sst [smem:[#allocation54_spill]] %s2771_s24  ;;  %s2818_s9 = sld [smem:[#allocation8 + $0x34]] }
  0xc2   : > { %3752 = sst [smem:[#allocation59_spill]] %s2789_s30  ;;  %s2852_s0 = sld [smem:[#allocation8 + $0x3e]] }
  0xc3   : > { %v802_v63 = vstv %s2678_s10  ;;  %s2854_s28 = sld [smem:[#allocation8 + $0x3b]]  ;;  %s2880_s24 = sld [smem:[#allocation8 + $0x1f]] }
  0xc4   : > { %3753 = sst [smem:[#allocation71_spill]] %s2791_s17  ;;  %s2885_s18 = sld [smem:[#allocation8 + $0x42]] }
  0xc5   : > { %s2904_s17 = sld [smem:[#allocation8 + $0x26]]  ;;  %s3773_s10 = sld [smem:[#allocation35_spill]] }
  0xc6   : > { %3754 = sst [smem:[#allocation72_spill]] %s2810_s4  ;;  %s3774_s29 = sld [smem:[#allocation41_spill]] }
  0xc7   : > { %s3772_s4 = sld [smem:[#allocation47_spill]]  ;;  %s3775_s23 = sld [smem:[#allocation53_spill]] }
  0xc8   : > { %3757 = sst [smem:[#allocation75_spill]] %s2852_s0  ;;  %s3777_s25 = sld [smem:[#allocation37_spill]] }
  0xc9   : > { %s3778_s0 = sld [smem:[#allocation55_spill]]  ;;  %s3781_s30 = sld [smem:[#allocation48_spill]] }
  0xca   : > { %s3798_s20 = sld [smem:[#allocation49_spill]]  ;;  %s3165_s1 = sld [smem:[#allocation8 + $0x50]] }
  0xcb   : > { %3758 = sst [smem:[#allocation76_spill]] %s2904_s17  ;;  %s3811_s17 = sld [smem:[#allocation51_spill]] }
  0xfd   : > { %v2584_v40 = vpop.permute.xlu1 %281  ;;  %v2586_v41 = vpop.permute.xlu0 %252 }
 0x101   : > { %v2628_v44 = vpop.permute.xlu0 %308  ;;  %v2630_v45 = vpop.permute.xlu1 %283 }
 0x102   : > { %v286_v26 = vsel %vm285_vm1, %v2584_v40, %v2630_v45  ;;  %v287_v1 = vsel %vm285_vm1, %v2630_v45, %v2584_v40  ;;  %v2816_v40 = vrot.slane %v823_v7, %v2564_v37  ;;  %v2821_v45 = vsub.s32 1, %v2545_v30 }
 0x103   : > { %v291_v6 = vcombine.low %v287_v1, %v286_v26 }
 0x104   : > { %3755 = vst [vmem:[#allocation73_spill] sm:$0xff] %v2816_v40 }
 0x105   : > { %v2682_v49 = vpop.permute.xlu0 %335  ;;  %v2684_v50 = vpop.permute.xlu1 %310  ;;  %v298_v1 = vrot.slane %v291_v6, %v2564_v37 }
 0x106   : > { %v313_v30 = vsel %vm312_vm2, %v2628_v44, %v2684_v50  ;;  %v314_v9 = vsel %vm312_vm2, %v2684_v50, %v2628_v44  ;;  %v672_v50 = vstv %s2765_s16  ;;  %s3800_s16 = sld [smem:[#allocation65_spill]] }
 0x107   : > { %v318_v3 = vcombine.low %v314_v9, %v313_v30  ;;  %v305_v30 = vrot.slane %v298_v1, %v2564_v37 }
 0x109   : > { %v2727_v60 = vpop.permute.xlu0 %362  ;;  %v2729_v25 = vpop.permute.xlu1 %337  ;;  %v325_v13 = vrot.slane %v318_v3, %v2564_v37 }
 0x10a   : > { %v340_v44 = vsel %vm339_vm3, %v2682_v49, %v2729_v25  ;;  %v341_v6 = vsel %vm339_vm3, %v2729_v25, %v2682_v49 }
 0x10b   : > { %v345_v15 = vcombine.low %v340_v44, %v341_v6 }
 0x10d   : > { %v2778_v57 = vpop.permute.xlu1 %364  ;;  %v2781_v55 = vpop.permute.xlu0 %254 }
 0x10e   : > { %v367_v11 = vsel %vm366_vm4, %v2727_v60, %v2778_v57  ;;  %v368_v25 = vsel %vm366_vm4, %v2778_v57, %v2727_v60  ;;  %v259_v49 = vsel %vm258_vm5, %v2586_v41, %v2781_v55  ;;  %v260_v9 = vsel %vm258_vm5, %v2781_v55, %v2586_v41 }
 0x10f   : > { %v372_v1 = vcombine.low %v367_v11, %v368_v25  ;;  %v264_v44 = vcombine.low %v260_v9, %v259_v49  ;;  %v2931_v11 = vrot.slane %v1393_v23, %v2564_v37  ;;  %v2935_v9 = vsel %vm288_vm6, %v305_v30, 0.0 }
 0x110   : > { %v332_v25 = vrot.slane %v325_v13, %v2564_v37  ;;  %v352_v49 = vrot.slane %v345_v15, %v2564_v37  ;;  %v3787_v15 = vstv %s3775_s23  ;;  %s3822_s23 = sld [smem:[#allocation61_spill]] }
 0x111   : > { %v975_v7 = vpop.permute.xlu1 %974  ;;  %v973_v54 = vpop.permute.xlu0 %972  ;;  %v379_v30 = vrot.slane %v372_v1, %v2564_v37  ;;  %v271_v13 = vrot.slane %v264_v44, %v2564_v37 }
 0x112   : > { %v976_v14 = vsel %vm258_vm5, %v973_v54, %v975_v7  ;;  %v2964_v22 = vsel %vm315_vm7, %v332_v25, 0.0  ;;  %v2976_v25 = vmul.f32 %v504_v32, %v2935_v9 }
 0x113   : > { %v424_v32 = vmul.f32 %v423_v43, %v2964_v22 }
 0x115   : > { %v1000_v12 = vpop.permute.xlu1 %999  ;;  %v998_v26 = vpop.permute.xlu0 %997 }
 0x116   : > { %v1001_v58 = vsel %vm285_vm1, %v998_v26, %v1000_v12  ;;  %v1002_v41 = vsel %vm285_vm1, %v1000_v12, %v998_v26  ;;  %v977_v12 = vsel %vm258_vm5, %v975_v7, %v973_v54 }
 0x119   : > { %v1025_v60 = vpop.permute.xlu1 %1024  ;;  %v1023_v57 = vpop.permute.xlu0 %1022 }
 0x11a   : > { %v1026_v55 = vsel %vm312_vm2, %v1023_v57, %v1025_v60  ;;  %v1027_v3 = vsel %vm312_vm2, %v1025_v60, %v1023_v57  ;;  %v1005_v60 = vcombine.low %v1002_v41, %v1001_v58  ;;  %v980_v58 = vcombine.low %v977_v12, %v976_v14 }
 0x11b   : > { %v1030_v26 = vcombine.low %v1027_v3, %v1026_v55  ;;  %v2957_v55 = vmul.f32 %v420_v31, %v2935_v9  ;;  %v359_v3 = vrot.slane %v352_v49, %v2564_v37  ;;  %v2981_v49 = vmul.f32 %v588_v36, %v2935_v9 }
 0x11c   : > { %v1012_v14 = vrot.slane %v1005_v60, %v2564_v37  ;;  %v386_v60 = vrot.slane %v379_v30, %v2564_v37  ;;  %v2996_v36 = vmul.f32 %v718_v42, %v2935_v9  ;;  %v3013_v42 = vmul.f32 %v721_v0, %v2964_v22 }
 0x11d   : > { %v1050_v54 = vpop.permute.xlu1 %1049  ;;  %v1048_v7 = vpop.permute.xlu0 %1047  ;;  %v1037_v41 = vrot.slane %v1030_v26, %v2564_v37  ;;  %v3000_v30 = vsel %vm342_vm8, %v359_v3, 0.0  ;;  %v3018_v3 = vmul.f32 %v802_v63, %v2935_v9 }
 0x11e   : > { %v1051_v57 = vsel %vm339_vm3, %v1048_v7, %v1050_v54  ;;  %v1052_v21 = vsel %vm339_vm3, %v1050_v54, %v1048_v7  ;;  %v278_v54 = vrot.slane %v271_v13, %v2564_v37  ;;  %v987_v7 = vrot.slane %v980_v58, %v2564_v37 }
 0x11f   : > { %v1055_v1 = vcombine.low %v1051_v57, %v1052_v21  ;;  %v1044_v21 = vrot.slane %v1037_v41, %v2564_v37  ;;  %v1019_v13 = vrot.slane %v1012_v14, %v2564_v37  ;;  %v3023_v14 = vmul.f32 %v672_v50, %v2935_v9 }
 0x120   : > { %v994_v0 = vrot.slane %v987_v7, %v2564_v37  ;;  %v3043_v50 = vmul.f32 %v430_v46, %v3000_v30 }
 0x121   : > { %v1075_v44 = vpop.permute.xlu1 %1074  ;;  %v1073_v12 = vpop.permute.xlu0 %1072  ;;  %v1062_v58 = vrot.slane %v1055_v1, %v2564_v37  ;;  %v3027_v1 = vsel %vm369_vm9, %v386_v60, 0.0  ;;  %v3053_v60 = vmul.f32 %v514_v51, %v3000_v30 }
 0x122   : > { %v1076_v31 = vsel %vm366_vm4, %v1073_v12, %v1075_v44  ;;  %v1077_v26 = vsel %vm366_vm4, %v1075_v44, %v1073_v12  ;;  %v508_v44 = vmul.f32 %v507_v35, %v2964_v22  ;;  %v3008_v35 = vmul.f32 %v591_v39, %v2964_v22 }
 0x123   : > { %v1080_v57 = vcombine.low %v1076_v31, %v1077_v26  ;;  %v3031_v39 = vsel %vm261_vm10, %v278_v54, 0.0  ;;  %v3037_v31 = vsel %vm315_vm7, %v1044_v21, 0.0  ;;  %v3048_v26 = vadd.f32 %v455_v34, %v424_v32 }
 0x124   : > { %v3057_v54 = vsel %vm288_vm6, %v1019_v13, 0.0  ;;  %v1069_v7 = vrot.slane %v1062_v58, %v2564_v37  ;;  %v3063_v38 = vadd.f32 %v539_v56, %v508_v44  ;;  %v3068_v34 = vmul.f32 %v598_v8, %v3000_v30 }
 0x125   : > { %v1087_v41 = vrot.slane %v1080_v57, %v2564_v37  ;;  %v392_v43 = vpop.permute.xlu1 %391  ;;  %v390_v12 = vpop.permute.xlu0 %389  ;;  %v418_v32 = vmul.f32 %v417_v47, %v3031_v39  ;;  %v3080_v27 = vmul.f32 %v433_v2, %v3027_v1  ;;  %v3084_v56 = vsel %vm261_vm10, %v994_v0, 0.0 }
 0x126   : > { %v1130_v13 = vmul.f32 %v1129_v53, %v3037_v31  ;;  %v394_v47 = vsel %vm393_vm11, %v390_v12, %v392_v43  ;;  %v395_v2 = vsel %vm393_vm11, %v392_v43, %v390_v12  ;;  %v1127_v58 = vmul.f32 %v1126_v24, %v3057_v54 }
 0x127   : > { %v1094_v63 = vrot.slane %v1087_v41, %v2564_v37  ;;  %v3776_v41 = vstv %s3747_s15  ;;  %v3107_v53 = vsel %vm342_vm8, %v1069_v7, 0.0  ;;  %v3780_v43 = vstv %s3748_s6  ;;  %s3788_s15 = sld [smem:[#allocation42_spill]]  ;;  %s3794_s6 = sld [smem:[#allocation38_spill]] }
 0x128   : > { %v3103_v0 = vmul.f32 %v3776_v41, %v3031_v39  ;;  %v3116_v12 = vmul.f32 %v3780_v43, %v3027_v1  ;;  %v3782_v24 = vstv %s3773_s10  ;;  %v3784_v7 = vstv %s2632_s8  ;;  %s3797_s8 = sld [smem:[#allocation43_spill]] }
 0x129   : > { %v1100_v46 = vpop.permute.xlu1 %1099  ;;  %v1098_v57 = vpop.permute.xlu0 %1097  ;;  %v3088_v8 = vsel %vm369_vm9, %v1094_v63, 0.0  ;;  %v3785_v43 = vrot.slane %v2645_v4, %v2564_v37  ;;  %v3792_v4 = vrot.slane %v2662_v48, %v2564_v37  ;;  %s3816_s10 = sld [smem:[#allocation60_spill]] }
 0x12a   : > { %v1101_v51 = vsel %vm393_vm11, %v1098_v57, %v1100_v46  ;;  %v1102_v21 = vsel %vm393_vm11, %v1100_v46, %v1098_v57  ;;  %v3779_v46 = vstv %s3772_s4  ;;  %v1222_v6 = vmul.f32 %v3784_v7, %v3088_v8  ;;  %s3814_s4 = sld [smem:[#allocation66_spill]] }
 0x12b   : > { %v1105_v44 = vcombine.low %v1101_v51, %v1102_v21  ;;  %v1212_v57 = vmul.f32 %v3779_v46, %v3037_v31  ;;  %v1124_v51 = vmul.f32 %v3782_v24, %v3084_v56  ;;  %v3783_v21 = vstv %s2619_s5  ;;  %s3791_s5 = sld [smem:[#allocation56_spill]] }
 0x12c   : > { %v1140_v41 = vmul.f32 %v3783_v21, %v3088_v8  ;;  %v399_v46 = vcombine.low %v394_v47, %v395_v2  ;;  %v1163_v23 = vadd.f32 %v3785_v43, %v1130_v13  ;;  %v3786_v24 = vstv %s3774_s29  ;;  %s3821_s29 = sld [smem:[#allocation44_spill]] }
 0x12d   : > { %v1112_v63 = vrot.slane %v1105_v44, %v2564_v37  ;;  %v3128_v44 = vadd.f32 %v2957_v55, %v418_v32  ;;  %v1209_v18 = vmul.f32 %v3786_v24, %v3057_v54  ;;  %v1137_v21 = vmul.f32 %v3787_v15, %v3107_v53 }
 0x12e   : > { %v1144_v10 = vadd.f32 %v1127_v58, %v1124_v51  ;;  %v3789_v7 = vstv %s3777_s25  ;;  %v3790_v55 = vstv %s3778_s0  ;;  %v1245_v13 = vadd.f32 %v3792_v4, %v1212_v57  ;;  %s3823_s25 = sld [smem:[#allocation62_spill]]  ;;  %s3221_s0 = sld [smem:[#allocation8 + $0x5e]] }
 0x12f   : > { %v1119_v20 = vrot.slane %v1112_v63, %v2564_v37  ;;  %v1206_v28 = vmul.f32 %v3789_v7, %v3084_v56  ;;  %v1219_v32 = vmul.f32 %v3790_v55, %v3107_v53  ;;  %v3793_v15 = vstv %s3781_s30  ;;  %s3828_s30 = sld [smem:[#allocation36_spill]] }
 0x130   : > { %v1294_v2 = vmul.f32 %v3793_v15, %v3037_v31  ;;  %v3795_v58 = vstv %s2647_s22  ;;  %v3796_v51 = vstv %s2699_s26  ;;  %v1164_v24 = vadd.f32 %v1140_v41, %v1137_v21  ;;  %s3802_s22 = sld [smem:[#allocation58_spill]]  ;;  %s3810_s26 = sld [smem:[#allocation46_spill]] }
 0x131   : > { %v3148_v47 = vsel %vm396_vm12, %v1119_v20, 0.0  ;;  %v1304_v63 = vmul.f32 %v3795_v58, %v3088_v8  ;;  %v3799_v20 = vstv %s2709_s14  ;;  %v1246_v55 = vadd.f32 %v1222_v6, %v1219_v32  ;;  %s3808_s14 = sld [smem:[#allocation40_spill]] }
 0x132   : > { %v1143_v43 = vmul.f32 %v3796_v51, %v3148_v47  ;;  %v1225_v7 = vmul.f32 %v3799_v20, %v3148_v47  ;;  %v406_v48 = vrot.slane %v399_v46, %v2564_v37  ;;  %v1165_v57 = vadd.f32 %v1163_v23, %v1144_v10 }
 0x133   : > { %v1226_v4 = vadd.f32 %v1209_v18, %v1206_v28  ;;  %v3801_v15 = vstv %s3788_s15  ;;  %v3803_v41 = vstv %s3791_s5  ;;  %v3804_v20 = vstv %s2713_s21  ;;  %s3192_s21 = sld [smem:[#allocation8 + $0x57]]  ;;  %s3252_s15 = sld [smem:[#allocation8 + $0x2d]] }
 0x134   : > { %v1291_v58 = vmul.f32 %v3801_v15, %v3057_v54  ;;  %v1166_v5 = vadd.f32 %v1164_v24, %v1143_v43  ;;  %v1248_v51 = vadd.f32 %v1246_v55, %v1225_v7  ;;  %v1301_v21 = vmul.f32 %v3803_v41, %v3107_v53  ;;  %s2149_s5 = smov 1  }
 0x135   : > { %v1307_v6 = vmul.f32 %v3804_v20, %v3148_v47  ;;  %v3805_v32 = vstv %s3794_s6  ;;  %v3806_v10 = vrot.slane %v2668_v52, %v2564_v37  ;;  %v3807_v23 = vstv %s3797_s8  ;;  %s3836_s6 = sld [smem:[#allocation64_spill]]  ;;  %s3281_s8 = sld [smem:[#allocation8 + $0x45]] }
 0x136   : > { %v1288_v40 = vmul.f32 %v3805_v32, %v3084_v56  ;;  %v1419_v18 = vmul.f32 %v3807_v23, %v3057_v54  ;;  %v3809_v46 = vstv %s3798_s20  ;;  %v1167_v24 = vadd.f32 %v1166_v5, %v1165_v57  ;;  %s3333_s20 = sld [smem:[#allocation8 + $0x5a]] }
 0x137   : > { %v1327_v28 = vadd.f32 %v3806_v10, %v1294_v2  ;;  %v1422_v43 = vmul.f32 %v3809_v46, %v3037_v31  ;;  %v1247_v7 = vadd.f32 %v1245_v13, %v1226_v4  ;;  %v1328_v55 = vadd.f32 %v1304_v63, %v1301_v21 }
 0x138   : > { %v3812_v15 = vstv %s3800_s16  ;;  %v413_v52 = vrot.slane %v406_v48, %v2564_v37  ;;  %v1308_v2 = vadd.f32 %v1291_v58, %v1288_v40  ;;  %v3813_v20 = vstv %s3802_s22  ;;  %s3359_s16 = sld [smem:[#allocation8 + $0x61]]  ;;  %s3860_s22 = sld [smem:[#allocation59_spill]] }
 0x139   : > { %v1432_v41 = vmul.f32 %v3812_v15, %v3088_v8  ;;  %v1429_v32 = vmul.f32 %v3813_v20, %v3107_v53  ;;  %v3815_v10 = vstv %s2722_s27  ;;  %v1176_v5 = vrot.slane %v1167_v24, %v2821_v45  ;;  %s2147_s27 = smov 3  }
 0x13a   : > { %v1435_v23 = vmul.f32 %v3815_v10, %v3148_v47  ;;  %v1172_v13 = vrot.slane %v1167_v24, %v2825_v17  ;;  %v1249_v63 = vadd.f32 %v1248_v51, %v1247_v7  ;;  %v1330_v57 = vadd.f32 %v1328_v55, %v1307_v6 }
 0x13b   : > { %v3817_v4 = vstv %s3808_s14  ;;  %v3818_v40 = vrot.slane %v2693_v59, %v2564_v37  ;;  %v3819_v21 = vstv %s3810_s26  ;;  %v3820_v15 = vstv %s3811_s17  ;;  %1181 = vrot.lane.b32.xlu1 %v1176_v5, %s2147_s27  ;;  %s3368_s14 = sld [smem:[#allocation8 + $0x37]]  ;;  %s3861_s26 = sld [smem:[#allocation50_spill]] }
 0x13c   : > { %v1416_v48 = vmul.f32 %v3817_v4, %v3084_v56  ;;  %v1501_v46 = vmul.f32 %v3819_v21, %v3057_v54  ;;  %v1504_v20 = vmul.f32 %v3820_v15, %v3037_v31  ;;  %1179 = vrot.lane.b32.xlu0 %v1172_v13, %s2147_s27  ;;  %v1329_v51 = vadd.f32 %v1327_v28, %v1308_v2  ;;  %s3863_s17 = sld [smem:[#allocation71_spill]] }
 0x13d   : > { %v1455_v58 = vadd.f32 %v3818_v40, %v1422_v43  ;;  %v1456_v6 = vadd.f32 %v1432_v41, %v1429_v32  ;;  %v3824_v24 = vstv %s3814_s4  ;;  %v1382_v43 = vstv %s3165_s1  ;;  %s3357_s1 = sld [smem:[#allocation8 + $0x53]]  ;;  %s3867_s4 = sld [smem:[#allocation54_spill]] }
 0x13e   : > { %v1514_v59 = vmul.f32 %v3824_v24, %v3088_v8  ;;  %v3225_v7 = vsel %vm396_vm12, %v413_v52, 0.0  ;;  %v1436_v55 = vadd.f32 %v1419_v18, %v1416_v48  ;;  %v3825_v10 = vstv %s3816_s10  ;;  %s3875_s10 = sld [smem:[#allocation75_spill]] }
 0x13f   : > { %v1511_v5 = vmul.f32 %v3825_v10, %v3107_v53  ;;  %v3826_v13 = vstv %s2725_s7  ;;  %v1258_v41 = vrot.slane %v1249_v63, %v2821_v45  ;;  %v1254_v2 = vrot.slane %v1249_v63, %v2825_v17  ;;  %s2148_s7 = smov 2  }
 0x140   : > { %v1517_v28 = vmul.f32 %v3826_v13, %v3148_v47  ;;  %v1331_v32 = vadd.f32 %v1330_v57, %v1329_v51  ;;  %v1458_v4 = vadd.f32 %v1456_v6, %v1435_v23  ;;  %v3827_v40 = vstv %s3821_s29  ;;  %s3880_s29 = sld [smem:[#allocation23_spill]] }
 0x141   : > { %v1498_v16 = vmul.f32 %v3827_v40, %v3084_v56  ;;  %v522_v18 = vadd.f32 %v2976_v25, %v3103_v0  ;;  %v3829_v52 = vstv %s3822_s23  ;;  %v3830_v21 = vstv %s3823_s25  ;;  %1263 = vrot.lane.b32.xlu1 %v1258_v41, %s2148_s7  ;;  %1261 = vrot.lane.b32.xlu0 %v1254_v2, %s2148_s7  ;;  %s3881_s23 = sld [smem:[#allocation18_spill]] }
 0x142   : > { %v586_v48 = vmul.f32 %v3829_v52, %v3031_v39  ;;  %v602_v15 = vmul.f32 %v3830_v21, %v3027_v1  ;;  %v1457_v63 = vadd.f32 %v1455_v58, %v1436_v55  ;;  %v3831_v23 = vrot.slane %v2737_v62, %v2564_v37 }
 0x143   : > { %v1538_v51 = vadd.f32 %v1514_v59, %v1511_v5  ;;  %v1385_v6 = vstv %s3192_s21  ;;  %v1518_v25 = vadd.f32 %v1501_v46, %v1498_v16  ;;  %v3832_v0 = vstv %s2740_s2  ;;  %s3835_s2 = sld [smem:[#allocation63_spill]]  ;;  %s3866_s21 = sld [smem:[#allocation52_spill]] }
 0x144   : > { %v1537_v57 = vadd.f32 %v3831_v23, %v1504_v20  ;;  %v437_v24 = vmul.f32 %v3832_v0, %v3225_v7  ;;  %v3833_v10 = vrot.slane %v2609_v33, %v2564_v37  ;;  %v3834_v58 = vstv %s3828_s30 }
 0x145   : > { %v3266_v55 = vmul.f32 %v3834_v58, %v3000_v30  ;;  %v1340_v62 = vrot.slane %v1331_v32, %v2821_v45  ;;  %v1336_v20 = vrot.slane %v1331_v32, %v2825_v17  ;;  %v1459_v46 = vadd.f32 %v1458_v4, %v1457_v63 }
 0x146   : > { %v3261_v13 = vadd.f32 %v3833_v10, %v3008_v35  ;;  %v1540_v59 = vadd.f32 %v1538_v51, %v1517_v28  ;;  %v458_v5 = vadd.f32 %v3080_v27, %v3043_v50  ;;  %v459_v33 = vadd.f32 %v3048_v26, %v3128_v44 }
 0x147   : > { %v542_v35 = vadd.f32 %v3116_v12, %v3053_v60  ;;  %v543_v41 = vadd.f32 %v3063_v38, %v522_v18  ;;  %1345 = vrot.lane.b32.xlu1 %v1340_v62, %s2149_s5  ;;  %1343 = vrot.lane.b32.xlu0 %v1336_v20, %s2149_s5  ;;  %v1539_v28 = vadd.f32 %v1537_v57, %v1518_v25  ;;  %v1388_v60 = vstv %s3221_s0  ;;  %s1797_s0 = sshll.u32 %s3880_s29, 1  ;;  %s1902_s30 = sshll.u32 %s3881_s23, 5 }
 0x148   : > { %v606_v50 = vadd.f32 %v2981_v49, %v586_v48  ;;  %v626_v26 = vadd.f32 %v602_v15, %v3068_v34  ;;  %v460_v27 = vadd.f32 %v458_v5, %v437_v24  ;;  %v3837_v38 = vstv %s2742_s13  ;;  %s2150_s13 = smov 127  }
 0x149   : > { %v521_v12 = vmul.f32 %v3837_v38, %v3225_v7  ;;  %v3838_v44 = vstv %s2754_s19  ;;  %v3839_v32 = vstv %s3835_s2  ;;  %v1468_v40 = vrot.slane %v1459_v46, %v2821_v45  ;;  %s3312_s19 = sld [smem:[#allocation8 + $0x30]] }
 0x14a   : > { %v605_v2 = vmul.f32 %v3838_v44, %v3225_v7  ;;  %v716_v4 = vmul.f32 %v3839_v32, %v3031_v39  ;;  %v1464_v49 = vrot.slane %v1459_v46, %v2825_v17  ;;  %v1541_v16 = vadd.f32 %v1540_v59, %v1539_v28 }
 0x14b   : > { %v3840_v34 = vstv %s2854_s28  ;;  %v3841_v52 = vstv %s3836_s6  ;;  %v3842_v21 = vstv %s2801_s3  ;;  %v3843_v63 = vstv %s2818_s9  ;;  %s3846_s3 = sld [smem:[#allocation76_spill]]  ;;  %s2151_s28 = smov 126  }
 0x14c   : > { %v1373_v18 = vmul.f32 %v3840_v34, %v3057_v54  ;;  %v732_v48 = vmul.f32 %v3841_v52, %v3027_v1  ;;  %v735_v15 = vmul.f32 %v3842_v21, %v3225_v7  ;;  %v1370_v23 = vmul.f32 %v3843_v63, %v3084_v56  ;;  %1473 = vrot.lane.b32.xlu1 %v1468_v40, %s2150_s13  ;;  %s3849_s9 = sld [smem:[#allocation68_spill]]  ;;  %s3884_s6 = sld [smem:[#allocation80_spill]] }
 0x14d   : > { %v3844_v57 = vstv %s2885_s18  ;;  %1471 = vrot.lane.b32.xlu0 %v1464_v49, %s2150_s13  ;;  %v1383_v25 = vmul.f32 %v1382_v43, %v3107_v53  ;;  %v1386_v0 = vmul.f32 %v1385_v6, %v3088_v8  ;;  %v1389_v24 = vmul.f32 %v1388_v60, %v3148_v47  ;;  %s3850_s18 = sld [smem:[#allocation70_spill]] }
 0x14e   : > { %v1376_v51 = vmul.f32 %v3844_v57, %v3037_v31  ;;  %v688_v10 = vstv %s3252_s15  ;;  %v461_v58 = vadd.f32 %v460_v27, %v459_v33  ;;  %v544_v62 = vadd.f32 %v542_v35, %v521_v12 }
 0x14f   : > { %v1390_v20 = vadd.f32 %v1373_v18, %v1370_v23  ;;  %v3845_v46 = vrot.slane %v2931_v11, %v2564_v37  ;;  %v1550_v5 = vrot.slane %v1541_v16, %v2821_v45  ;;  %v1546_v28 = vrot.slane %v1541_v16, %v2825_v17 }
 0x150   : > { %v1410_v43 = vadd.f32 %v1386_v0, %v1383_v25  ;;  %v3847_v6 = vstv %s2805_s12  ;;  %v628_v60 = vadd.f32 %v626_v26, %v605_v2  ;;  %v736_v44 = vadd.f32 %v2996_v36, %v716_v4  ;;  %s3853_s12 = sld [smem:[#allocation67_spill]] }
 0x151   : > { %v1409_v59 = vadd.f32 %v3845_v46, %v1376_v51  ;;  %v670_v38 = vmul.f32 %v3847_v6, %v3031_v39  ;;  %v3848_v35 = vstv %s2773_s11  ;;  %1555 = vrot.lane.b32.xlu1 %v1550_v5, %s2151_s28  ;;  %1553 = vrot.lane.b32.xlu0 %v1546_v28, %s2151_s28  ;;  %v1585_v11 = vstv %s3281_s8  ;;  %s3857_s11 = sld [smem:[#allocation72_spill]] }
 0x152   : > { %v676_v27 = vmul.f32 %v3848_v35, %v2964_v22  ;;  %v1412_v12 = vadd.f32 %v1410_v43, %v1389_v24  ;;  %v3851_v32 = vstv %s2880_s24  ;;  %v3852_v36 = vstv %s3846_s3  ;;  %s3855_s24 = sld [smem:[#allocation69_spill]]  ;;  %s3541_s8 = scalar_lea.hbm %s3884_s6, %s1902_s30 }
 0x153   : > { %v1411_v33 = vadd.f32 %v1409_v59, %v1390_v20  ;;  %v683_v26 = vmul.f32 %v3851_v32, %v3000_v30  ;;  %v686_v2 = vmul.f32 %v3852_v36, %v3027_v1  ;;  %v545_v4 = vadd.f32 %v544_v62, %v543_v41  ;;  %v3871_v32 = vld [vmem:[#allocation73_spill] sm:$0xff]  ;;  %s2153_s3 = smov [#allocation9]  }
 0x154   : > { %v689_v40 = vmul.f32 %v688_v10, %v3225_v7  ;;  %v690_v49 = vadd.f32 %v3023_v14, %v670_v38  ;;  %v3854_v16 = vrot.slane %v2867_v29, %v2564_v37  ;;  %v470_v18 = vrot.slane %v461_v58, %v2821_v45 }
 0x155   : > { %v466_v52 = vrot.slane %v461_v58, %v2825_v17  ;;  %v3348_v21 = vadd.f32 %v1412_v12, %v1411_v33  ;;  %v710_v63 = vadd.f32 %v686_v2, %v683_v26  ;;  %v756_v41 = vadd.f32 %v732_v48, %v3266_v55 }
 0x156   : > { %v709_v34 = vadd.f32 %v3854_v16, %v676_v27  ;;  %v3856_v23 = vstv %s3849_s9  ;;  %v3858_v14 = vstv %s3850_s18  ;;  %475 = vrot.lane.b32.xlu1 %v470_v18, %s2147_s27  ;;  %v627_v25 = vadd.f32 %v3261_v13, %v606_v50 }
 0x157   : > { %v800_v57 = vmul.f32 %v3856_v23, %v3031_v39  ;;  %v816_v51 = vmul.f32 %v3858_v14, %v3027_v1  ;;  %473 = vrot.lane.b32.xlu0 %v466_v52, %s2147_s27  ;;  %v3859_v55 = vstv %s3853_s12  ;;  %v902_v0 = vstv %s3312_s19  ;;  %v3876_v14 = vld [vmem:[#allocation74_spill] sm:$0xff]  ;;  %s2152_s27 = smov 125  }
 0x158   : > { %v711_v29 = vadd.f32 %v709_v34, %v690_v49  ;;  %v806_v48 = vmul.f32 %v3859_v55, %v2964_v22  ;;  %v712_v24 = vadd.f32 %v710_v63, %v689_v40  ;;  %v3862_v10 = vrot.slane %v2748_v61, %v2564_v37 }
 0x159   : > { %v758_v62 = vadd.f32 %v756_v41, %v735_v15  ;;  %v3864_v20 = vstv %s3855_s24  ;;  %v3865_v50 = vstv %s3857_s11  ;;  %v554_v59 = vrot.slane %v545_v4, %v2821_v45 }
 0x15a   : > { %v755_v58 = vadd.f32 %v3862_v10, %v3013_v42  ;;  %v813_v13 = vmul.f32 %v3864_v20, %v3000_v30  ;;  %v819_v46 = vmul.f32 %v3865_v50, %v3225_v7  ;;  %v550_v5 = vrot.slane %v545_v4, %v2825_v17 }
 0x15b   : > { %v629_v28 = vadd.f32 %v628_v60, %v627_v25  ;;  %v3382_v43 = vadd.f32 %v712_v24, %v711_v29  ;;  %v820_v61 = vadd.f32 %v3018_v3, %v800_v57  ;;  %v3868_v15 = vstv %s3860_s22  ;;  %559 = vrot.lane.b32.xlu1 %v554_v59, %s2148_s7 }
 0x15c   : > { %v757_v6 = vadd.f32 %v755_v58, %v736_v44  ;;  %v840_v42 = vadd.f32 %v816_v51, %v813_v13  ;;  %v884_v38 = vmul.f32 %v3868_v15, %v3031_v39  ;;  %557 = vrot.lane.b32.xlu0 %v550_v5, %s2148_s7  ;;  %v3869_v33 = vstv %s3861_s26  ;;  %s213_s7 = scalar_lea.vmem [#allocation9], %s1797_s0 }
 0x15d   : > { %v887_v35 = vmul.f32 %v3869_v33, %v2935_v9  ;;  %v3870_v60 = vstv %s3863_s17  ;;  %v1595_v44 = vstv %s3333_s20  ;;  %v1617_v3 = vrot.slane %v2947_v19, %v2564_v37  ;;  %s1693_s15 = sshll.u32 %s213_s7, 4  ;;  %s3543_s15 = int_to_ptr.vmem [resolvable:$true] %s1693_s15 }
 0x15e   : > { %v900_v27 = vmul.f32 %v3870_v60, %v3027_v1  ;;  %v759_v12 = vadd.f32 %v758_v62, %v757_v6  ;;  %v3872_v39 = vrot.slane %v3871_v32, %v2564_v37  ;;  %v842_v36 = vadd.f32 %v840_v42, %v819_v46  ;;  %v3879_v32 = vld [vmem:[#allocation57_spill] sm:$0xff]  ;;  %s2061_s19 = scalar_lea.vmem %s3543_s15, 32 }
 0x15f   : > { %v3873_v2 = vstv %s3866_s21  ;;  %v638_v40 = vrot.slane %v629_v28, %v2821_v45  ;;  %v634_v9 = vrot.slane %v629_v28, %v2825_v17  ;;  %v3874_v1 = vstv %s3867_s4  ;;  %p2062_p7 = scmp.ne.s32.totalorder %s3543_s15, %s2061_s19 }
 0x160   : > { %v839_v26 = vadd.f32 %v3872_v39, %v806_v48  ;;  %v890_v4 = vmul.f32 %v3873_v2, %v2964_v22  ;;  %v897_v49 = vmul.f32 %v3874_v1, %v3000_v30  ;;  %v903_v16 = vmul.f32 %v902_v0, %v3225_v7 }
 0x161   : > { %v904_v34 = vadd.f32 %v887_v35, %v884_v38  ;;  %v1592_v18 = vstv %s3357_s1  ;;  %v1598_v52 = vstv %s3359_s16  ;;  %643 = vrot.lane.b32.xlu1 %v638_v40, %s2149_s5  ;;  %641 = vrot.lane.b32.xlu0 %v634_v9, %s2149_s5  ;;  %v1586_v41 = vmul.f32 %v1585_v11, %v3037_v31  ;;  %p2063_p12 = pnand %p2062_p7, %p2281_p10 }
 0x162   : > { %v841_v19 = vadd.f32 %v839_v26, %v820_v61  ;;  %v924_v63 = vadd.f32 %v900_v27, %v897_v49  ;;  %v1579_v22 = vstv %s3368_s14  ;;  %v1596_v23 = vmul.f32 %v1595_v44, %v3088_v8 }
 0x163   : > { %v768_v57 = vrot.slane %v759_v12, %v2821_v45  ;;  %v764_v30 = vrot.slane %v759_v12, %v2825_v17  ;;  %v3877_v51 = vrot.slane %v3876_v14, %v2564_v37  ;;  %v3878_v55 = vstv %s3875_s10  ;;  %p2064_p9 = pneg %p2063_p12 }
 0x164   : > { %v843_v7 = vadd.f32 %v842_v36, %v841_v19  ;;  %v926_v25 = vadd.f32 %v924_v63, %v903_v16  ;;  %v1583_v48 = vmul.f32 %v3878_v55, %v3057_v54  ;;  %v1593_v0 = vmul.f32 %v1592_v18, %v3107_v53 }
 0x165   : > { %v923_v29 = vadd.f32 %v3877_v51, %v890_v4  ;;  %v1599_v24 = vmul.f32 %v1598_v52, %v3148_v47  ;;  %v1580_v31 = vmul.f32 %v1579_v22, %v3084_v56  ;;  %773 = vrot.lane.b32.xlu1 %v768_v57, %s2150_s13  ;;  %771 = vrot.lane.b32.xlu0 %v764_v30, %s2150_s13  ;;  %vm645_vm13 = vcmp.lt.s32.totalorder %v3879_v32, 1  ;;  %s1679_s13 = scalar_lea.sflag [#allocation4], %s3880_s29 }
 0x166   : > { %v1619_v11 = vadd.f32 %v1617_v3, %v1586_v41  ;;  %v1620_v10 = vadd.f32 %v1596_v23, %v1593_v0  ;;  %v852_v58 = vrot.slane %v843_v7, %v2821_v45  ;;  %v848_v62 = vrot.slane %v843_v7, %v2825_v17 }
 0x167   : > { %v925_v8 = vadd.f32 %v923_v29, %v904_v34  ;;  %v1600_v13 = vadd.f32 %v1583_v48, %v1580_v31  ;;  %vm477_vm14 = vcmp.lt.s32.totalorder %v3879_v32, 3  ;;  %vm561_vm15 = vcmp.lt.s32.totalorder %v3879_v32, 2 }
 0x168   : > { %v1622_v54 = vadd.f32 %v1620_v10, %v1599_v24  ;;  %vm775_vm0 = vcmp.lt.s32.totalorder %v3879_v32, 127  ;;  %vm859_vm1 = vcmp.lt.s32.totalorder %v3879_v32, 126  ;;  %vm943_vm3 = vcmp.lt.s32.totalorder %v3879_v32, 125 }
 0x169   : > { %v927_v20 = vadd.f32 %v926_v25, %v925_v8  ;;  %857 = vrot.lane.b32.xlu1 %v852_v58, %s2151_s28  ;;  %855 = vrot.lane.b32.xlu0 %v848_v62, %s2151_s28  ;;  %v1621_v53 = vadd.f32 %v1619_v11, %v1600_v13  ;;  %v3473_v8 = vld [vmem:[#allocation6 + $0x1] ss:$2 sm:$0x3]  ;;  %s2065_s28 = sshll.u32 %s2153_s3, 4  ;;  %s2066_s28 = int_to_ptr.vmem [resolvable:$false] %s2065_s28 }
 0x16a   : > { %vm564_vm2 = vcmp.ge.s32.totalorder %v3473_v8, 2  ;;  %vm648_vm4 = vcmp.ge.s32.totalorder %v3473_v8, 1  ;;  %vm862_vm5 = vcmp.lt.s32.totalorder %v3473_v8, 14  ;;  %vm946_vm6 = vcmp.lt.s32.totalorder %v3473_v8, 13  ;;  %s2067_s9 = scalar_lea.vmem %s2066_s28, 64  ;;  %p2068_p2 = scmp.lt.s32.totalorder %s3543_s15, %s2066_s28 }
 0x16b   : > { %v936_v56 = vrot.slane %v927_v20, %v2821_v45  ;;  %v932_v47 = vrot.slane %v927_v20, %v2825_v17  ;;  %v1623_v50 = vadd.f32 %v1622_v54, %v1621_v53  ;;  %vm480_vm7 = vcmp.ge.s32.totalorder %v3473_v8, 3  ;;  %p2069_p4 = scmp.lt.s32.totalorder %s2067_s9, %s2061_s19 }
 0x16c   : > { %vm778_vm8 = vcmp.lt.s32.totalorder %v3473_v8, 15 }
 0x16d   : > { %941 = vrot.lane.b32.xlu1 %v936_v56, %s2152_s27  ;;  %939 = vrot.lane.b32.xlu0 %v932_v47, %s2152_s27  ;;  %v1632_v46 = vrot.slane %v1623_v50, %v2821_v45  ;;  %v1628_v59 = vrot.slane %v1623_v50, %v2825_v17  ;;  %p2070_p6 = por %p2069_p4, %p2068_p2 }
 0x16f   : > { %p2071_p8 = pnand %p2070_p6, %p2064_p9 }
 0x171   : > { %1637 = vrot.lane.b32.xlu1 %v1632_v46, %s2152_s27  ;;  %1635 = vrot.lane.b32.xlu0 %v1628_v59, %s2152_s27 }
 0x1ad   : > { %v1182_v5 = vpop.permute.xlu1 %1181 }
 0x1ae   : > { %v1180_v28 = vpop.permute.xlu0 %1179 }
 0x1af   : > { %v1183_v36 = vsel %vm477_vm14, %v1180_v28, %v1182_v5  ;;  %v1184_v2 = vsel %vm477_vm14, %v1182_v5, %v1180_v28 }
 0x1b0   : > { %v1187_v51 = vcombine.low %v1184_v2, %v1183_v36 }
 0x1b2   : > { %v1194_v54 = vrot.slane %v1187_v51, %v2564_v37 }
 0x1b3   : > { %v1264_v6 = vpop.permute.xlu1 %1263  ;;  %v1262_v61 = vpop.permute.xlu0 %1261 }
 0x1b4   : > { %v1265_v4 = vsel %vm561_vm15, %v1262_v61, %v1264_v6  ;;  %v1266_v40 = vsel %vm561_vm15, %v1264_v6, %v1262_v61 }
 0x1b5   : > { %v1269_v29 = vcombine.low %v1266_v40, %v1265_v4 }
 0x1b7   : > { %v1276_v53 = vrot.slane %v1269_v29, %v2564_v37 }
 0x1b9   : > { %v1346_v42 = vpop.permute.xlu1 %1345  ;;  %v1344_v15 = vpop.permute.xlu0 %1343 }
 0x1ba   : > { %v1347_v39 = vsel %vm645_vm13, %v1344_v15, %v1346_v42  ;;  %v1348_v26 = vsel %vm645_vm13, %v1346_v42, %v1344_v15 }
 0x1bb   : > { %v1351_v49 = vcombine.low %v1348_v26, %v1347_v39 }
 0x1bd   : > { %v1358_v55 = vrot.slane %v1351_v49, %v2564_v37 }
 0x1be   : > { %v1474_v38 = vpop.permute.xlu1 %1473 }
 0x1bf   : > { %v1472_v33 = vpop.permute.xlu0 %1471  ;;  %v1365_v47 = vrot.slane %v1358_v55, %v2564_v37 }
 0x1c0   : > { %v1475_v16 = vsel %vm775_vm0, %v1472_v33, %v1474_v38  ;;  %v1476_v57 = vsel %vm775_vm0, %v1474_v38, %v1472_v33 }
 0x1c1   : > { %v1479_v11 = vcombine.low %v1475_v16, %v1476_v57 }
 0x1c3   : > { %v1556_v35 = vpop.permute.xlu1 %1555  ;;  %v1554_v60 = vpop.permute.xlu0 %1553  ;;  %v1486_v6 = vrot.slane %v1479_v11, %v2564_v37 }
 0x1c4   : > { %v1557_v19 = vsel %vm859_vm1, %v1554_v60, %v1556_v35  ;;  %v1558_v34 = vsel %vm859_vm1, %v1556_v35, %v1554_v60  ;;  %v1201_v60 = vrot.slane %v1194_v54, %v2564_v37 }
 0x1c5   : > { %v1561_v25 = vcombine.low %v1557_v19, %v1558_v34  ;;  %v1493_v36 = vrot.slane %v1486_v6, %v2564_v37 }
 0x1c6   : > { %v1203_v57 = vsel %vm480_vm7, %v1201_v60, 0.0 }
 0x1c7   : > { %v1568_v56 = vrot.slane %v1561_v25, %v2564_v37 }
 0x1c8   : > { %v476_v27 = vpop.permute.xlu1 %475 }
 0x1c9   : > { %v474_v44 = vpop.permute.xlu0 %473 }
 0x1ca   : > { %v478_v30 = vsel %vm477_vm14, %v474_v44, %v476_v27  ;;  %v479_v7 = vsel %vm477_vm14, %v476_v27, %v474_v44  ;;  %v1283_v27 = vrot.slane %v1276_v53, %v2564_v37  ;;  %v1575_v44 = vrot.slane %v1568_v56, %v2564_v37 }
 0x1cb   : > { %v483_v10 = vcombine.low %v479_v7, %v478_v30  ;;  %v1495_v30 = vsel %vm778_vm8, %v1493_v36, 0.0 }
 0x1cc   : > { %v1285_v19 = vsel %vm564_vm2, %v1283_v27, 0.0  ;;  %v1577_v32 = vsel %vm862_vm5, %v1575_v44, 0.0 }
 0x1cd   : > { %v560_v3 = vpop.permute.xlu1 %559  ;;  %v490_v61 = vrot.slane %v483_v10, %v2564_v37  ;;  %v1660_v51 = vadd.f32 %v1285_v19, %v1203_v57  ;;  %v1662_v29 = vadd.f32 %v1577_v32, %v1495_v30 }
 0x1ce   : > { %v558_v12 = vpop.permute.xlu0 %557 }
 0x1cf   : > { %v562_v63 = vsel %vm561_vm15, %v558_v12, %v560_v3  ;;  %v563_v22 = vsel %vm561_vm15, %v560_v3, %v558_v12  ;;  %v1367_v3 = vsel %vm648_vm4, %v1365_v47, 0.0  ;;  %v497_v2 = vrot.slane %v490_v61, %v2564_v37 }
 0x1d0   : > { %v567_v48 = vcombine.low %v563_v22, %v562_v63  ;;  %v1661_v22 = vadd.f32 %v3348_v21, %v1367_v3 }
 0x1d1   : > { %v499_v7 = vsel %vm480_vm7, %v497_v2, 0.0 }
 0x1d2   : > { %v574_v50 = vrot.slane %v567_v48, %v2564_v37 }
 0x1d3   : > { %v644_v17 = vpop.permute.xlu1 %643  ;;  %v642_v45 = vpop.permute.xlu0 %641 }
 0x1d4   : > { %v646_v9 = vsel %vm645_vm13, %v642_v45, %v644_v17  ;;  %v647_v1 = vsel %vm645_vm13, %v644_v17, %v642_v45  ;;  %v581_v12 = vrot.slane %v574_v50, %v2564_v37 }
 0x1d5   : > { %v651_v14 = vcombine.low %v647_v1, %v646_v9 }
 0x1d6   : > { %v583_v34 = vsel %vm564_vm2, %v581_v12, 0.0 }
 0x1d7   : > { %v774_v18 = vpop.permute.xlu1 %773  ;;  %v772_v52 = vpop.permute.xlu0 %771  ;;  %v658_v20 = vrot.slane %v651_v14, %v2564_v37  ;;  %v966_v25 = vadd.f32 %v583_v34, %v499_v7 }
 0x1d8   : > { %v776_v41 = vsel %vm775_vm0, %v772_v52, %v774_v18  ;;  %v777_v23 = vsel %vm775_vm0, %v774_v18, %v772_v52 }
 0x1d9   : > { %v781_v0 = vcombine.low %v776_v41, %v777_v23  ;;  %v665_v38 = vrot.slane %v658_v20, %v2564_v37 }
 0x1db   : > { %v858_v24 = vpop.permute.xlu1 %857  ;;  %v856_v31 = vpop.permute.xlu0 %855  ;;  %v788_v46 = vrot.slane %v781_v0, %v2564_v37  ;;  %v667_v9 = vsel %vm648_vm4, %v665_v38, 0.0  ;;  %v1663_v0 = vadd.f32 %v1661_v22, %v1660_v51 }
 0x1dc   : > { %v860_v58 = vsel %vm859_vm1, %v856_v31, %v858_v24  ;;  %v861_v62 = vsel %vm859_vm1, %v858_v24, %v856_v31  ;;  %v967_v41 = vadd.f32 %v3382_v43, %v667_v9 }
 0x1dd   : > { %v865_v13 = vcombine.low %v860_v58, %v861_v62  ;;  %v795_v17 = vrot.slane %v788_v46, %v2564_v37  ;;  %v3883_v62 = vlaneseq }
 0x1de   : > { %v969_v24 = vadd.f32 %v967_v41, %v966_v25 }
 0x1df   : > { %v872_v59 = vrot.slane %v865_v13, %v2564_v37  ;;  %v942_v5 = vpop.permute.xlu1 %941  ;;  %v940_v28 = vpop.permute.xlu0 %939  ;;  %v797_v18 = vsel %vm778_vm8, %v795_v17, 0.0  ;;  %vm1675_vm9 = vcmp.lt.s32.totalorder %v3883_v62, 256 }
 0x1e0   : > { %v944_v42 = vsel %vm943_vm3, %v940_v28, %v942_v5  ;;  %v945_v15 = vsel %vm943_vm3, %v942_v5, %v940_v28 }
 0x1e1   : > { %v879_v33 = vrot.slane %v872_v59, %v2564_v37  ;;  %v949_v35 = vcombine.low %v944_v42, %v945_v15 }
 0x1e3   : > { %v956_v45 = vrot.slane %v949_v35, %v2564_v37  ;;  %v1638_v39 = vpop.permute.xlu1 %1637  ;;  %v1636_v26 = vpop.permute.xlu0 %1635  ;;  %v881_v1 = vsel %vm862_vm5, %v879_v33, 0.0 }
 0x1e4   : > { %v1639_v4 = vsel %vm943_vm3, %v1636_v26, %v1638_v39  ;;  %v1640_v40 = vsel %vm943_vm3, %v1638_v39, %v1636_v26  ;;  %v968_v23 = vadd.f32 %v881_v1, %v797_v18 }
 0x1e5   : > { %v963_v49 = vrot.slane %v956_v45, %v2564_v37  ;;  %v1643_v16 = vcombine.low %v1639_v4, %v1640_v40 }
 0x1e7   : > { %v965_v52 = vsel %vm946_vm6, %v963_v49, 0.0  ;;  %v1650_v63 = vrot.slane %v1643_v16, %v2564_v37 }
 0x1e8   : > { %v970_v55 = vadd.f32 %v968_v23, %v965_v52 }
 0x1e9   : > { %v1657_v14 = vrot.slane %v1650_v63, %v2564_v37 }
 0x1ea   : > { %v971_v31 = vadd.f32 %v970_v55, %v969_v24 }
 0x1eb   : > { %v1659_v48 = vsel %vm946_vm6, %v1657_v14, 0.0 }
 0x1ec   : > { %v1664_v21 = vadd.f32 %v1662_v29, %v1659_v48 }
 0x1ee   : > { %v1665_v43 = vadd.f32 %v1664_v21, %v1663_v0 }
 0x1f0   : > { %v1666_v11 = vadd.f32 %v1665_v43, %v971_v31 }
 0x1f2   : > { %v1895_v10 = vmul.f32 -1.442695, %v1666_v11 }
 0x1f4   : > { %1984 = vpow2.f32 %v1895_v10 }
 0x1fe   : > { %v1985_v37 = vpop.eup %1984 }
 0x1ff   : > { %v1670_v58 = vadd.f32 1.0, %v1985_v37 }
 0x201   : > { %1986 = vrcp.f32 %v1670_v58 }
 0x20b   : > { %v1987_v8 = vpop.eup %1986 }
 0x20c   : > { %1677 = vst.msk [vmem:[%s213_s7] sm:$0x3] %vm1675_vm9, %v1987_v8 }
 0x20d   : > { %2074 = shalt.err (!%p2071_p8)
}
 0x20e   : > { %s2075_s18 = scalar_lea.hbm %s3541_s8, 32  ;;  %s2079_s24 = scalar_lea.hbm %s3884_s6, 64 }
 0x20f   : > { %p2076_p1 = scmp.ne.s32.totalorder %s3541_s8, %s2075_s18  ;;  %p2080_p11 = scmp.lt.u32.totalorder %s3541_s8, %s3884_s6 }
 0x210   : > { %p2081_p3 = scmp.lt.u32.totalorder %s2079_s24, %s2075_s18  ;;  %p2083_p7 = scmp.lt.u32.totalorder %s2075_s18, %s3541_s8 }
 0x211   : > { %p2077_p0 = pnand %p2076_p1, %p2281_p10 }
 0x212   : > { %p2082_p5 = por %p2081_p3, %p2080_p11 }
 0x213   : > { %p2078_p13 = pneg %p2077_p0 }
 0x214   : > { %p2084_p12 = por %p2083_p7, %p2082_p5 }
 0x216   : > { %p2085_p9 = pnand %p2084_p12, %p2078_p13 }
 0x218   : > { %2088 = shalt.err (!%p2085_p9)
}
 0x219   : > { %1913 = dma.vmem_to_hbm [thread:$0]  (%p2281_p10), %s3543_s15, 32, %s3541_s8, %s1679_s13  }
 0x21a PF: > { %s3885_s16 = sld [smem:[#allocation14_spill]]  ;;  %s3886_s22 = sld [smem:[#allocation19_spill]] }
 0x21b   : > { %s3887_s14 = sld [smem:[#allocation17_spill]] }
 0x220   : > { %s1705_s26 = sand.u32 1, %s3885_s16   ;;  %p3888_p2 = scmp.ne.s32.totalorder %s3886_s22, 0 }
 0x221   : > { %p3889_p4 = scmp.ge.s32.totalorder %s3887_s14, 2  ;;  %s1706_s17 = scalar_lea.sflag [#allocation4], %s1705_s26 }
 0x223   : > { %p1927_p6 = pnand %p3889_p4, %p3888_p2 }
 0x225   : > { %2118 = dma.done.wait (!%p1927_p6), %s1706_s17, 32  }
 0x226   : > { %2120 = vsyncadd (!%p1927_p6), %s1706_s17, 4294967264  ;;  %s3890_s15 = sld [smem:[#allocation20_spill]]  ;;  %s3891_s12 = sld [smem:[#allocation15_spill]] }
 0x227   : > { %s3892_s13 = sld [smem:[#allocation16_spill]]  ;;  %s3893_s14 = sld [smem:[#allocation21_spill]] }
 0x22c   : > { %p18_p8 = scmp.ge.s32.totalorder %s3890_s15, 4  }
 0x22e   :  { %20 = sbr.rel (!%p18_p8) target bundleno = 12 (0xc), region = 87 }
 0x235   :  { %1711 = vsyncpa [#allocation3], 1 }
 0x236   :  { %1713 = vsyncpa [#allocation3 + $0x1], 1 }
 0x237   :  { %1714 = vsyncpa [#allocation7], 1 }
 0x238   :  { %1715 = vsyncpa [#allocation4], 1 }
 0x239   :  { %1717 = vsyncpa [#allocation4 + $0x1], 1 }
 0x23a   :  { %1718 = vsyncpa [#allocation5], 1 }
 0x23b   :  { %1720 = vsyncpa [#allocation5 + $0x1], 1 }

</bundles_post_ra>
